<compile_context>
chip_gen: v6e
topology: v6e:2x2x1
jax: 0.10.0
libtpu: 0.0.40
codegen_flags: <defaults>
</compile_context>

<pallas_src>
import functools

import numpy as np
import jax
import jax.numpy as jnp
from jax.experimental import pallas as pl
from jax.experimental.pallas import tpu as pltpu

EPS = float(np.finfo(np.float32).eps)  # == torch.finfo(torch.float).eps


def _round_up(x, m):
    return ((x + m - 1) // m) * m


# ----------------------------------------------------------------------------
# Deterministic parameter construction (mirrors the PyTorch module __init__)
# ----------------------------------------------------------------------------
def hamming_window(win_length):
    # torch.hamming_window(win_length): periodic=True, alpha=.54, beta=.46
    n = np.arange(win_length, dtype=np.float64)
    return (0.54 - 0.46 * np.cos(2.0 * np.pi * n / win_length)).astype(np.float32)


def get_mel_banks(num_mel_bins, num_fft_bins, sample_freq, low_freq, high_freq,
                  norm="slaney"):
    # vtln=False branch of the PyTorch get_mel_banks
    all_freqs = np.linspace(0, sample_freq // 2, num_fft_bins // 2 + 1)
    m_min = 2595.0 * np.log10(1.0 + low_freq / 700.0)
    m_max = 2595.0 * np.log10(1.0 + high_freq / 700.0)
    m_pts = np.linspace(m_min, m_max, num_mel_bins + 2)
    f_pts = 700.0 * (10.0 ** (m_pts / 2595.0) - 1.0)
    f_diff = f_pts[1:] - f_pts[:-1]
    slopes = f_pts[None, :] - all_freqs[:, None]
    down_slopes = -1.0 * slopes[:, :-2] / f_diff[:-1]
    up_slopes = slopes[:, 2:] / f_diff[1:]
    fb = np.maximum(0.0, np.minimum(down_slopes, up_slopes))
    if norm is not None and norm == "slaney":
        enorm = 2.0 / (f_pts[2:num_mel_bins + 2] - f_pts[:num_mel_bins])
        fb = fb * enorm[None, :]
    return fb.T.astype(np.float32)  # (n_mels, n_freq_bins)


# ----------------------------------------------------------------------------
# Pallas kernel: TM frames -> frame slab -> windowed DFT -> power -> mel -> dB
# ----------------------------------------------------------------------------
def fbank_kernel(chunk_ref, tail_ref, wdh_ref, wdl_ref, mel_ref, out_ref,
                 bcomb_ref, frame_ref, *, tm, tail, hop, n_fft, ncf, fp,
                 mean, inv_std):
    body = tm - tail

    # ---- assemble the (tm, n_fft) overlapped-frame slab in VMEM ------------
    # Boundary slab: last TAIL chunk rows of this tile followed by the first
    # TAIL chunk rows of the next tile (both copies are sublane-aligned).
    bcomb_ref[pl.ds(0, tail), pl.ds(0, hop)] = \
        chunk_ref[0, pl.ds(body, tail), pl.ds(0, hop)]
    bcomb_ref[pl.ds(tail, tail), pl.ds(0, hop)] = tail_ref[0]

    # frame[f, j*hop + r] = chunks[f + j, r]   (j = 0..ncf-1, static unroll)
    for j in range(ncf):
        w = min(hop, n_fft - j * hop)
        col = j * hop
        frame_ref[pl.ds(0, body), pl.ds(col, w)] = \
            chunk_ref[0, pl.ds(j, body), pl.ds(0, w)]
        frame_ref[pl.ds(body, tail), pl.ds(col, w)] = \
            bcomb_ref[pl.ds(j, tail), pl.ds(0, w)]

    # ---- windowed real DFT: one granule-exact K = n_fft contraction --------
    # Split-precision bf16 operands, f32 accumulation.  Single-pass bf16 is
    # not accurate enough for the dB-domain low-frequency mel bins (the
    # pre-emphasis filter suppresses them ~30 dB below the frame energy that
    # sets the bf16 rounding floor), so frame and Wd each carry an 8-bit
    # residual; the lo*lo term (~2^-16 relative) is dropped.
    f32 = frame_ref[...]
    f_hi = f32.astype(jnp.bfloat16)
    f_lo = (f32 - f_hi.astype(jnp.float32)).astype(jnp.bfloat16)
    acc = jnp.dot(f_hi, wdh_ref[...], preferred_element_type=jnp.float32)
    acc = acc + jnp.dot(f_hi, wdl_ref[...], preferred_element_type=jnp.float32)
    acc = acc + jnp.dot(f_lo, wdh_ref[...], preferred_element_type=jnp.float32)

    re = acc[:, :fp]
    im = acc[:, fp:]
    power = re * re + im * im            # f32 VPU; 1/n_fft folded into mel

    # ---- mel projection, emitted transposed: (n_mels_pad, tm) --------------
    # Contraction over the freq axis of both operands (flash-style rhs.T);
    # power is non-negative -> plain bf16 operands are accuracy-safe here.
    fb_t = jnp.dot(mel_ref[...], power.astype(jnp.bfloat16).T,
                   preferred_element_type=jnp.float32)
    out_ref[0] = (20.0 * jnp.log10(fb_t + EPS) - mean) * inv_std


# ----------------------------------------------------------------------------
# Wrapper (forward pass, matches FilterBank.forward with cmvn=None)
# ----------------------------------------------------------------------------
def filterbank_forward(x, length=None, *, n_fft=512, hop_length=160, n_mels=40,
                       sample_rate=16000, f_min=0.0, f_max=8000.0,
                       preemphasis_coefficient=0.97, mean=0.0, std=1.0,
                       frames_per_tile=256):
    # TODO(synk): vector cmvn (per-mel mean/std loaded from a file) is not
    # supported; only the scalar mean/std of the cmvn=None default path.
    x = jnp.asarray(x, jnp.float32)
    squeeze = (x.ndim == 1)
    if squeeze:
        x = x[None, :]
    B, T = x.shape
    hop = hop_length

    # ---- cheap elementwise glue in plain JAX (1x data, no gather) ----------
    emph = jnp.concatenate(
        [x[:, :1], x[:, 1:] - preemphasis_coefficient * x[:, :-1]], axis=-1)
    if T % hop == 0:
        pad = (n_fft - hop, 0)
    else:
        pad = (n_fft - hop, hop - T % hop)
    L = T + pad[0] + pad[1]
    n_frames = (L - n_fft) // hop + 1

    # ---- static tiling parameters -------------------------------------------
    ncf = -(-n_fft // hop)                        # chunks per frame (ceil)
    TAIL = _round_up(max(ncf - 1, 1), 8)          # boundary rows from next tile
    step = int(np.lcm(TAIL, 16))                  # TM multiple of TAIL and 16
    TM = _round_up(max(2 * TAIL, min(frames_per_tile, n_frames)), step)
    n_tiles = -(-n_frames // TM)
    n_frames_pad = n_tiles * TM
    n_chunk_rows = n_frames_pad + TAIL
    total_samples = n_chunk_rows * hop            # >= L; extra zeros only feed
                                                  # discarded pad frames
    padded = jnp.pad(emph, ((0, 0), (pad[0], total_samples - T - pad[0])))
    chunks = padded.reshape(B, n_chunk_rows, hop)  # pure reshape, no gather

    # ---- deterministic parameters (window folded into the DFT weights) -----
    F = n_fft // 2 + 1
    win = hamming_window(n_fft).astype(np.float64)
    mel = get_mel_banks(n_mels, n_fft, sample_rate, f_min, f_max)  # (n_mels, F)

    # Drop the Nyquist bin when its mel weight is (numerically) zero
    # (exact for f_max == sample_rate/2 with slaney triangles).
    F_used = F
    nyq_w = float(np.abs(mel[:, F - 1]).max())
    if nyq_w <= 1e-6 * max(1.0, float(np.abs(mel).max())):
        F_used = F - 1
    Fp = _round_up(F_used, 128)                   # 256 with defaults

    nn_ = np.arange(n_fft, dtype=np.float64)
    kk_ = np.arange(F_used, dtype=np.float64)
    ang = 2.0 * np.pi * np.outer(nn_, kk_) / n_fft
    Wd = np.zeros((n_fft, 2 * Fp), np.float32)            # (512, 512) default
    Wd[:, :F_used] = (win[:, None] * np.cos(ang)).astype(np.float32)
    Wd[:, Fp:Fp + F_used] = (-win[:, None] * np.sin(ang)).astype(np.float32)
    # hi/lo bf16 split of the DFT weights (lo = bf16 of the f32 residual)
    wd_f32 = jnp.asarray(Wd)
    wd_hi = wd_f32.astype(jnp.bfloat16)
    wd_lo = (wd_f32 - wd_hi.astype(jnp.float32)).astype(jnp.bfloat16)

    NMP = _round_up(n_mels, 8)                    # 48 with defaults
    melPad = np.zeros((NMP, Fp), np.float32)
    melPad[:n_mels, :F_used] = mel[:, :F_used] / float(n_fft)  # fold 1/n_fft
    mel_bf = jnp.asarray(melPad).astype(jnp.bfloat16)

    kernel = functools.partial(
        fbank_kernel, tm=TM, tail=TAIL, hop=hop, n_fft=n_fft, ncf=ncf, fp=Fp,
        mean=float(mean), inv_std=1.0 / (float(std) + EPS))

    flops = 2 * B * n_frames_pad * (3 * n_fft * 2 * Fp + NMP * Fp)
    bytes_accessed = (4 * B * n_chunk_rows * hop          # chunks (f32)
                      + 4 * B * NMP * n_frames_pad        # output (f32)
                      + 2 * 2 * n_fft * 2 * Fp            # Wd hi+lo (bf16)
                      + 2 * NMP * Fp)                     # mel (bf16)

    tm_over_tail = TM // TAIL

    out = pl.pallas_call(
        kernel,
        out_shape=jax.ShapeDtypeStruct((B, NMP, n_frames_pad), jnp.float32),
        grid=(B, n_tiles),
        in_specs=[
            # this tile's TM chunk rows
            pl.BlockSpec((1, TM, hop), lambda b, t: (b, t, 0)),
            # first TAIL chunk rows of the NEXT tile (non-overlapping block)
            pl.BlockSpec((1, TAIL, hop),
                         lambda b, t: (b, (t + 1) * tm_over_tail, 0)),
            # window-folded [cos | -sin] DFT weights (bf16 hi / lo), resident
            pl.BlockSpec((n_fft, 2 * Fp), lambda b, t: (0, 0)),
            pl.BlockSpec((n_fft, 2 * Fp), lambda b, t: (0, 0)),
            # mel weights (1/n_fft folded, transposed-output layout), resident
            pl.BlockSpec((NMP, Fp), lambda b, t: (0, 0)),
        ],
        out_specs=pl.BlockSpec((1, NMP, TM), lambda b, t: (b, 0, t)),
        scratch_shapes=[pltpu.VMEM((2 * TAIL, hop), jnp.float32),
                        pltpu.VMEM((TM, n_fft), jnp.float32)],
        compiler_params=pltpu.CompilerParams(
            dimension_semantics=("parallel", "parallel")),
        cost_estimate=pl.CostEstimate(
            flops=int(flops),
            transcendentals=int(B * n_frames_pad * NMP),
            bytes_accessed=int(bytes_accessed)),
    )(chunks, chunks, wd_hi, wd_lo, mel_bf)

    # (B, NMP, n_frames_pad) -> slice valid mels/frames (already transposed)
    fbank = out[:, :n_mels, :n_frames]
    if squeeze:
        fbank = fbank[0]

    out_length = None
    if length is not None:
        out_length = jnp.ceil(
            jnp.asarray(length).astype(jnp.float32) / hop).astype(jnp.int32)
    return fbank, out_length


# ----------------------------------------------------------------------------
# Pure-numpy reference (float64) used only for the self-test
# ----------------------------------------------------------------------------
def _reference_numpy(x, n_fft=512, hop=160, n_mels=40, sr=16000,
                     fmin=0.0, fmax=8000.0, pre=0.97, mean=0.0, std=1.0):
    x = np.asarray(x, np.float64)
    emph = np.concatenate([x[:, :1], x[:, 1:] - pre * x[:, :-1]], axis=-1)
    T = x.shape[-1]
    pad = (n_fft - hop, 0) if T % hop == 0 else (n_fft - hop, hop - T % hop)
    p = np.pad(emph, ((0, 0), pad))
    L = p.shape[-1]
    nfr = (L - n_fft) // hop + 1
    win = hamming_window(n_fft).astype(np.float64)
    idx = np.arange(nfr)[:, None] * hop + np.arange(n_fft)[None, :]
    frames = p[:, idx] * win                              # (B, nfr, n_fft)
    X = np.fft.rfft(frames, n=n_fft, axis=-1)
    power = (X.real ** 2 + X.imag ** 2) / n_fft           # (B, nfr, F)
    mel = get_mel_banks(n_mels, n_fft, sr, fmin, fmax).astype(np.float64)
    fb = np.einsum("mf,bnf->bmn", mel, power)             # (B, n_mels, nfr)
    return (20.0 * np.log10(fb + EPS) - mean) / (std + EPS)


if __name__ == "__main__":
    key = jax.random.PRNGKey(0)
    B, T = 2, 1600                      # 0.1 s @ 16 kHz -> 10 frames each
    x = jax.random.normal(key, (B, T), dtype=jnp.float32)
    length = jnp.array([1600, 1200], dtype=jnp.int32)

    fbank, out_len = filterbank_forward(x, length)
    fbank = jax.block_until_ready(fbank)
    out_len = jax.block_until_ready(out_len)

    assert fbank.shape == (B, 40, 10), fbank.shape
    assert bool(jnp.all(jnp.isfinite(fbank)))
    assert list(np.asarray(out_len)) == [10, 8], np.asarray(out_len)

    ref = _reference_numpy(np.asarray(x))
    np.testing.assert_allclose(np.asarray(fbank), ref, rtol=0.0, atol=0.5)
    print("KERNEL_OK")
</pallas_src>

<mosaic_0001>
module attributes {stable_mosaic.version = 11 : i64} {
  func.func @fbank_kernel(%arg0: i32, %arg1: i32, %arg2: memref<1x16x160xf32, #tpu.memory_space<vmem>>, %arg3: memref<1x8x160xf32, #tpu.memory_space<vmem>>, %arg4: memref<512x512xbf16, #tpu.memory_space<vmem>>, %arg5: memref<512x512xbf16, #tpu.memory_space<vmem>>, %arg6: memref<40x256xbf16, #tpu.memory_space<vmem>>, %arg7: memref<1x40x16xf32, #tpu.memory_space<vmem>>, %arg8: memref<16x160xf32, #tpu.memory_space<vmem>>, %arg9: memref<16x512xf32, #tpu.memory_space<vmem>>) attributes {dimension_semantics = [#tpu.dimension_semantics<parallel>, #tpu.dimension_semantics<parallel>], iteration_bounds = array<i64: 2, 1>, scalar_prefetch = 0 : i64, scratch_operands = 2 : i64, tpu.core_type = #tpu.core_type<tc>, window_params = [{transform_indices = @transform_0, window_bounds = array<i64: 1, 16, 160>}, {transform_indices = @transform_1, window_bounds = array<i64: 1, 8, 160>}, {pipeline_mode = #tpu.pipeline_mode<synchronous>, transform_indices = @transform_2, window_bounds = array<i64: 512, 512>}, {pipeline_mode = #tpu.pipeline_mode<synchronous>, transform_indices = @transform_3, window_bounds = array<i64: 512, 512>}, {pipeline_mode = #tpu.pipeline_mode<synchronous>, transform_indices = @transform_4, window_bounds = array<i64: 40, 256>}, {transform_indices = @transform_5, window_bounds = array<i64: 1, 40, 16>}]} {
    %c0 = arith.constant 0 : index
    %c8 = arith.constant 8 : index
    %c0_0 = arith.constant 0 : index
    %0 = vector.load %arg2[%c0, %c8, %c0_0] : memref<1x16x160xf32, #tpu.memory_space<vmem>>, vector<1x8x160xf32>
    %1 = vector.shape_cast %0 : vector<1x8x160xf32> to vector<8x160xf32>
    %c0_1 = arith.constant 0 : index
    %c0_2 = arith.constant 0 : index
    %2 = vector.load %arg8[%c0_1, %c0_2] : memref<16x160xf32, #tpu.memory_space<vmem>>, vector<8x160xf32>
    tpu.vector_store %arg8[%c0_1, %c0_2], %1 {strides = array<i32>} : memref<16x160xf32, #tpu.memory_space<vmem>>, vector<8x160xf32>,
    %c0_3 = arith.constant 0 : index
    %c0_4 = arith.constant 0 : index
    %c0_5 = arith.constant 0 : index
    %3 = vector.load %arg3[%c0_3, %c0_4, %c0_5] : memref<1x8x160xf32, #tpu.memory_space<vmem>>, vector<1x8x160xf32>
    %4 = vector.shape_cast %3 : vector<1x8x160xf32> to vector<8x160xf32>
    %c8_6 = arith.constant 8 : index
    %c0_7 = arith.constant 0 : index
    %5 = vector.load %arg8[%c8_6, %c0_7] : memref<16x160xf32, #tpu.memory_space<vmem>>, vector<8x160xf32>
    tpu.vector_store %arg8[%c8_6, %c0_7], %4 {strides = array<i32>} : memref<16x160xf32, #tpu.memory_space<vmem>>, vector<8x160xf32>,
    %c0_8 = arith.constant 0 : index
    %c0_9 = arith.constant 0 : index
    %c0_10 = arith.constant 0 : index
    %6 = vector.load %arg2[%c0_8, %c0_9, %c0_10] : memref<1x16x160xf32, #tpu.memory_space<vmem>>, vector<1x8x160xf32>
    %7 = vector.shape_cast %6 : vector<1x8x160xf32> to vector<8x160xf32>
    %c0_11 = arith.constant 0 : index
    %c0_12 = arith.constant 0 : index
    %8 = vector.load %arg9[%c0_11, %c0_12] : memref<16x512xf32, #tpu.memory_space<vmem>>, vector<8x160xf32>
    tpu.vector_store %arg9[%c0_11, %c0_12], %7 {strides = array<i32>} : memref<16x512xf32, #tpu.memory_space<vmem>>, vector<8x160xf32>,
    %c0_13 = arith.constant 0 : index
    %c0_14 = arith.constant 0 : index
    %9 = vector.load %arg8[%c0_13, %c0_14] : memref<16x160xf32, #tpu.memory_space<vmem>>, vector<8x160xf32>
    %c8_15 = arith.constant 8 : index
    %c0_16 = arith.constant 0 : index
    %10 = vector.load %arg9[%c8_15, %c0_16] : memref<16x512xf32, #tpu.memory_space<vmem>>, vector<8x160xf32>
    tpu.vector_store %arg9[%c8_15, %c0_16], %9 {strides = array<i32>} : memref<16x512xf32, #tpu.memory_space<vmem>>, vector<8x160xf32>,
    %c0_17 = arith.constant 0 : index
    %c1 = arith.constant 1 : index
    %c0_18 = arith.constant 0 : index
    %11 = vector.load %arg2[%c0_17, %c1, %c0_18] : memref<1x16x160xf32, #tpu.memory_space<vmem>>, vector<1x8x160xf32>
    %12 = vector.shape_cast %11 : vector<1x8x160xf32> to vector<8x160xf32>
    %c0_19 = arith.constant 0 : index
    %c160 = arith.constant 160 : index
    %13 = vector.load %arg9[%c0_19, %c160] : memref<16x512xf32, #tpu.memory_space<vmem>>, vector<8x160xf32>
    tpu.vector_store %arg9[%c0_19, %c160], %12 {strides = array<i32>} : memref<16x512xf32, #tpu.memory_space<vmem>>, vector<8x160xf32>,
    %c1_20 = arith.constant 1 : index
    %c0_21 = arith.constant 0 : index
    %14 = vector.load %arg8[%c1_20, %c0_21] : memref<16x160xf32, #tpu.memory_space<vmem>>, vector<8x160xf32>
    %c8_22 = arith.constant 8 : index
    %c160_23 = arith.constant 160 : index
    %15 = vector.load %arg9[%c8_22, %c160_23] : memref<16x512xf32, #tpu.memory_space<vmem>>, vector<8x160xf32>
    tpu.vector_store %arg9[%c8_22, %c160_23], %14 {strides = array<i32>} : memref<16x512xf32, #tpu.memory_space<vmem>>, vector<8x160xf32>,
    %c0_24 = arith.constant 0 : index
    %c2 = arith.constant 2 : index
    %c0_25 = arith.constant 0 : index
    %16 = vector.load %arg2[%c0_24, %c2, %c0_25] : memref<1x16x160xf32, #tpu.memory_space<vmem>>, vector<1x8x160xf32>
    %17 = vector.shape_cast %16 : vector<1x8x160xf32> to vector<8x160xf32>
    %c0_26 = arith.constant 0 : index
    %c320 = arith.constant 320 : index
    %18 = vector.load %arg9[%c0_26, %c320] : memref<16x512xf32, #tpu.memory_space<vmem>>, vector<8x160xf32>
    tpu.vector_store %arg9[%c0_26, %c320], %17 {strides = array<i32>} : memref<16x512xf32, #tpu.memory_space<vmem>>, vector<8x160xf32>,
    %c2_27 = arith.constant 2 : index
    %c0_28 = arith.constant 0 : index
    %19 = vector.load %arg8[%c2_27, %c0_28] : memref<16x160xf32, #tpu.memory_space<vmem>>, vector<8x160xf32>
    %c8_29 = arith.constant 8 : index
    %c320_30 = arith.constant 320 : index
    %20 = vector.load %arg9[%c8_29, %c320_30] : memref<16x512xf32, #tpu.memory_space<vmem>>, vector<8x160xf32>
    tpu.vector_store %arg9[%c8_29, %c320_30], %19 {strides = array<i32>} : memref<16x512xf32, #tpu.memory_space<vmem>>, vector<8x160xf32>,
    %c0_31 = arith.constant 0 : index
    %c3 = arith.constant 3 : index
    %c0_32 = arith.constant 0 : index
    %21 = vector.load %arg2[%c0_31, %c3, %c0_32] : memref<1x16x160xf32, #tpu.memory_space<vmem>>, vector<1x8x32xf32>
    %22 = vector.shape_cast %21 : vector<1x8x32xf32> to vector<8x32xf32>
    %c0_33 = arith.constant 0 : index
    %c480 = arith.constant 480 : index
    %23 = vector.load %arg9[%c0_33, %c480] : memref<16x512xf32, #tpu.memory_space<vmem>>, vector<8x32xf32>
    tpu.vector_store %arg9[%c0_33, %c480], %22 {strides = array<i32>} : memref<16x512xf32, #tpu.memory_space<vmem>>, vector<8x32xf32>,
    %c3_34 = arith.constant 3 : index
    %c0_35 = arith.constant 0 : index
    %24 = vector.load %arg8[%c3_34, %c0_35] : memref<16x160xf32, #tpu.memory_space<vmem>>, vector<8x32xf32>
    %c8_36 = arith.constant 8 : index
    %c480_37 = arith.constant 480 : index
    %25 = vector.load %arg9[%c8_36, %c480_37] : memref<16x512xf32, #tpu.memory_space<vmem>>, vector<8x32xf32>
    tpu.vector_store %arg9[%c8_36, %c480_37], %24 {strides = array<i32>} : memref<16x512xf32, #tpu.memory_space<vmem>>, vector<8x32xf32>,
    %c0_38 = arith.constant 0 : index
    %c0_39 = arith.constant 0 : index
    %26 = vector.load %arg9[%c0_38, %c0_39] : memref<16x512xf32, #tpu.memory_space<vmem>>, vector<16x512xf32>
    %27 = arith.truncf %26 : vector<16x512xf32> to vector<16x512xbf16>
    %28 = arith.extf %27 : vector<16x512xbf16> to vector<16x512xf32>
    %29 = arith.subf %26, %28 : vector<16x512xf32>
    %30 = arith.truncf %29 : vector<16x512xf32> to vector<16x512xbf16>
    %c0_40 = arith.constant 0 : index
    %c0_41 = arith.constant 0 : index
    %31 = vector.load %arg4[%c0_40, %c0_41] : memref<512x512xbf16, #tpu.memory_space<vmem>>, vector<512x512xbf16>
    %cst = arith.constant dense<0.000000e+00> : vector<16x512xf32>
    %32 = tpu.matmul %27, %31, %cst {dimension_numbers = #tpu.dot_dimension_numbers<[1], [0], [0], [1], [0, 0, 1, 1], [], []>} : vector<16x512xbf16>, vector<512x512xbf16>, vector<16x512xf32> -> vector<16x512xf32>
    %c0_42 = arith.constant 0 : index
    %c0_43 = arith.constant 0 : index
    %33 = vector.load %arg5[%c0_42, %c0_43] : memref<512x512xbf16, #tpu.memory_space<vmem>>, vector<512x512xbf16>
    %cst_44 = arith.constant dense<0.000000e+00> : vector<16x512xf32>
    %34 = tpu.matmul %27, %33, %cst_44 {dimension_numbers = #tpu.dot_dimension_numbers<[1], [0], [0], [1], [0, 0, 1, 1], [], []>} : vector<16x512xbf16>, vector<512x512xbf16>, vector<16x512xf32> -> vector<16x512xf32>
    %35 = arith.addf %32, %34 : vector<16x512xf32>
    %c0_45 = arith.constant 0 : index
    %c0_46 = arith.constant 0 : index
    %36 = vector.load %arg4[%c0_45, %c0_46] : memref<512x512xbf16, #tpu.memory_space<vmem>>, vector<512x512xbf16>
    %cst_47 = arith.constant dense<0.000000e+00> : vector<16x512xf32>
    %37 = tpu.matmul %30, %36, %cst_47 {dimension_numbers = #tpu.dot_dimension_numbers<[1], [0], [0], [1], [0, 0, 1, 1], [], []>} : vector<16x512xbf16>, vector<512x512xbf16>, vector<16x512xf32> -> vector<16x512xf32>
    %38 = arith.addf %35, %37 : vector<16x512xf32>
    %39 = vector.extract_strided_slice %38 {offsets = [0, 0], sizes = [16, 256], strides = [1, 1]} : vector<16x512xf32> to vector<16x256xf32>
    %40 = vector.extract_strided_slice %38 {offsets = [0, 256], sizes = [16, 256], strides = [1, 1]} : vector<16x512xf32> to vector<16x256xf32>
    %41 = arith.mulf %39, %39 : vector<16x256xf32>
    %42 = arith.mulf %40, %40 : vector<16x256xf32>
    %43 = arith.addf %41, %42 : vector<16x256xf32>
    %c0_48 = arith.constant 0 : index
    %c0_49 = arith.constant 0 : index
    %44 = vector.load %arg6[%c0_48, %c0_49] : memref<40x256xbf16, #tpu.memory_space<vmem>>, vector<40x256xbf16>
    %45 = arith.truncf %43 : vector<16x256xf32> to vector<16x256xbf16>
    %46 = tpu.transpose %45, [1, 0] : vector<16x256xbf16> -> vector<256x16xbf16>
    %cst_50 = arith.constant dense<0.000000e+00> : vector<40x16xf32>
    %47 = tpu.matmul %44, %46, %cst_50 {dimension_numbers = #tpu.dot_dimension_numbers<[1], [0], [0], [1], [0, 0, 1, 1], [], []>} : vector<40x256xbf16>, vector<256x16xbf16>, vector<40x16xf32> -> vector<40x16xf32>
    %cst_51 = arith.constant 1.1920929E-7 : f32
    %48 = vector.broadcast %cst_51 : f32 to vector<40x16xf32>
    %49 = arith.addf %47, %48 : vector<40x16xf32>
    %50 = math.log %49 : vector<40x16xf32>
    %cst_52 = arith.constant 0.434294492 : f32
    %51 = vector.broadcast %cst_52 : f32 to vector<40x16xf32>
    %52 = arith.mulf %50, %51 : vector<40x16xf32>
    %cst_53 = arith.constant 2.000000e+01 : f32
    %53 = vector.broadcast %cst_53 : f32 to vector<40x16xf32>
    %54 = arith.mulf %53, %52 : vector<40x16xf32>
    %cst_54 = arith.constant 0.000000e+00 : f32
    %55 = vector.broadcast %cst_54 : f32 to vector<40x16xf32>
    %56 = arith.subf %54, %55 : vector<40x16xf32>
    %cst_55 = arith.constant 0.99999988 : f32
    %57 = vector.broadcast %cst_55 : f32 to vector<40x16xf32>
    %58 = arith.mulf %56, %57 : vector<40x16xf32>
    %c0_56 = arith.constant 0 : index
    %c0_57 = arith.constant 0 : index
    %c0_58 = arith.constant 0 : index
    %59 = vector.load %arg7[%c0_56, %c0_57, %c0_58] : memref<1x40x16xf32, #tpu.memory_space<vmem>>, vector<1x40x16xf32>
    %60 = vector.shape_cast %59 : vector<1x40x16xf32> to vector<40x16xf32>
    %61 = vector.shape_cast %58 : vector<40x16xf32> to vector<1x40x16xf32>
    tpu.vector_store %arg7[%c0_56, %c0_57, %c0_58], %61 {strides = array<i32>} : memref<1x40x16xf32, #tpu.memory_space<vmem>>, vector<1x40x16xf32>,
    return
  }
  func.func @transform_0(%arg0: i32, %arg1: i32) -> (i32, i32, i32) {
    %c0_i32 = arith.constant 0 : i32
    %c0_i32_0 = arith.constant 0 : i32
    return %arg0, %arg1, %c0_i32 : i32, i32, i32
  }
  func.func @transform_1(%arg0: i32, %arg1: i32) -> (i32, i32, i32) {
    %c1_i32 = arith.constant 1 : i32
    %0 = arith.addi %arg1, %c1_i32 : i32
    %c2_i32 = arith.constant 2 : i32
    %1 = arith.muli %0, %c2_i32 : i32
    %c0_i32 = arith.constant 0 : i32
    %c0_i32_0 = arith.constant 0 : i32
    return %arg0, %1, %c0_i32 : i32, i32, i32
  }
  func.func @transform_2(%arg0: i32, %arg1: i32) -> (i32, i32) {
    %c0_i32 = arith.constant 0 : i32
    %c0_i32_0 = arith.constant 0 : i32
    %c0_i32_1 = arith.constant 0 : i32
    return %c0_i32, %c0_i32_0 : i32, i32
  }
  func.func @transform_3(%arg0: i32, %arg1: i32) -> (i32, i32) {
    %c0_i32 = arith.constant 0 : i32
    %c0_i32_0 = arith.constant 0 : i32
    %c0_i32_1 = arith.constant 0 : i32
    return %c0_i32, %c0_i32_0 : i32, i32
  }
  func.func @transform_4(%arg0: i32, %arg1: i32) -> (i32, i32) {
    %c0_i32 = arith.constant 0 : i32
    %c0_i32_0 = arith.constant 0 : i32
    %c0_i32_1 = arith.constant 0 : i32
    return %c0_i32, %c0_i32_0 : i32, i32
  }
  func.func @transform_5(%arg0: i32, %arg1: i32) -> (i32, i32, i32) {
    %c0_i32 = arith.constant 0 : i32
    %c0_i32_0 = arith.constant 0 : i32
    return %arg0, %c0_i32, %arg1 : i32, i32, i32
  }
}

</mosaic_0001>

<bundles_post_ra>
// kernel: tpu_custom_call.1
= control target key start
LH: loop header
LB: loop body
LE: loop exit
PB: predicated region body
PF: predicated region fallthrough
CT: control target
= control target key end

     0   :  { %s4728_s0 = inlined_call_operand.hbm [shape: f32[2,24,160], index: 0, kind: input, shape index: {}]   ;;  %s4729_s1 = inlined_call_operand.hbm [shape: f32[2,24,160], index: 1, kind: input, shape index: {}]   ;;  %s4730_s2 = inlined_call_operand.hbm [shape: bf16[512,512], index: 2, kind: input, shape index: {}]   ;;  %s4731_s3 = inlined_call_operand.hbm [shape: bf16[512,512], index: 3, kind: input, shape index: {}]   ;;  %s4732_s4 = inlined_call_operand.hbm [shape: bf16[40,256], index: 4, kind: input, shape index: {}]   ;;  %s4733_s5 = inlined_call_operand.vmem [shape: f32[2,40,16], index: 5, kind: output, shape index: {}]  }
   0x1   :  { %4804 = sst [smem:[#allocation85_spill]] %s4728_s0 }
   0x2   :  { %4805 = sst [smem:[#allocation86_spill]] %s4730_s2 }
   0x3   :  { %4806 = sst [smem:[#allocation87_spill]] %s4731_s3 }
   0x4   :  { %4807 = sst [smem:[#allocation88_spill]] %s4732_s4 }
   0x5   :  { %10 = vsyncpa [#allocation5], 0 }
   0x6   :  { %12 = vsyncpa [#allocation5 + $0x1], 0 }
   0x7   :  { %13 = vsyncpa [#allocation7], 0 }
   0x8   :  { %15 = vsyncpa [#allocation7 + $0x1], 0 }
   0x9   :  { %16 = vsyncpa [#allocation10], 0  ;;  %s3917_s18 = smov 0   ;;  %s3919_s19 = smov 0  }
   0xa   :  { %s3921_s20 = smov 0   ;;  %s3923_s21 = smov 0  }
   0xb   :  { %s3925_s22 = smov 0   ;;  %s3927_s23 = smov 0  }
   0xc LB: > { %s4734_s24 = sadd.s32 4294967295, %s3873_s23   ;;  %p56_p0 = scmp.ne.s32.totalorder %s3857_s19, %s3853_s18  ;;  %s3873_s23 = sphi %s3927_s23, %s22_s23   ;;  %s3869_s22 = sphi %s3925_s22, %s4960_s22   ;;  %s3865_s21 = sphi %s3923_s21, %s4959_s21   ;;  %s3861_s20 = sphi %s3921_s20, %s4958_s20   ;;  %s3857_s19 = sphi %s3919_s19, %s4957_s19   ;;  %s3853_s18 = sphi %s3917_s18, %s4956_s18  }
   0xd   : > { %p3949_p1 = scmp.eq.s32.totalorder %s4734_s24, 0  ;;  %p2890_p2 = scmp.ge.s32.totalorder %s3873_s23, 1 }
   0xe   : > { %p190_p3 = scmp.lt.s32.totalorder %s3873_s23, 3  ;;  %s3875_s28 = smov [#allocation8]  }
   0xf   : > { %p3957_p4 = por %p3949_p1, %p56_p0  ;;  %s202_s29 = sshll.u32 %s3875_s28, 4  ;;  %s203_s29 = int_to_ptr.vmem [resolvable:$true] %s202_s29 }
  0x10   : > { %p3961_p5 = pnand %p2890_p2, %p190_p3  ;;  %s3876_s6 = smov [#allocation9]  }
  0x11   : > { %s215_s7 = sshll.u32 %s3876_s6, 4  ;;  %s3877_s8 = smov [#allocation11]   ;;  %s216_s7 = int_to_ptr.vmem [resolvable:$true] %s215_s7 }
  0x12   : > { %p3190_p6 = pneg %p3961_p5  ;;  %s228_s9 = sshll.u32 %s3877_s8, 4  ;;  %s229_s9 = int_to_ptr.vmem [resolvable:$true] %s228_s9 }
  0x13   : > { %s3687_s10 = scalar_lea.vmem %s203_s29, 16384  ;;  %p3695_p12 = scmp.lt.s32.totalorder %s203_s29, %s203_s29 }
  0x14   : > { %p3969_p7 = pnand %p3190_p6, %p3949_p1  ;;  %p3688_p9 = scmp.ne.s32.totalorder %s203_s29, %s3687_s10 }
  0x15   : > { %p3696_p13 = scmp.lt.s32.totalorder %s3687_s10, %s3687_s10 }
  0x16   : > { %p3678_p8 = pneg %p3969_p7 }
  0x17   : > { %p3697_p0 = por %p3696_p13, %p3695_p12 }
  0x18   : > { %p3690_p10 = pnand %p3688_p9, %p3678_p8 }
  0x1a   : > { %p3691_p11 = pneg %p3690_p10 }
  0x1c   : > { %p3698_p2 = pnand %p3697_p0, %p3691_p11 }
  0x1e   : > { %3701 = shalt.err (!%p3698_p2)
}
  0x1f   : > { %s3878_s11 = smov 256   ;;  %s3879_s12 = smov 16  }
  0x20   : > { %s4812_s2 = sld [smem:[#allocation86_spill]]  ;;  %s3713_s15 = scalar_lea.vmem %s216_s7, 16384 }
  0x21   : > { %p3714_p3 = scmp.ne.s32.totalorder %s216_s7, %s3713_s15  ;;  %p3721_p10 = scmp.lt.s32.totalorder %s216_s7, %s216_s7 }
  0x22   : > { %p3722_p11 = scmp.lt.s32.totalorder %s3713_s15, %s3713_s15 }
  0x23   : > { %p3716_p6 = pnand %p3714_p3, %p3678_p8 }
  0x24   : > { %p3723_p12 = por %p3722_p11, %p3721_p10 }
  0x25   : > { %p3717_p9 = pneg %p3716_p6 }
  0x26   : > { %3193 = dma.hbm_to_vmem [thread:$0]  (!%p3969_p7), %s4812_s2, 16384, %s203_s29, [#allocation7], %s3878_s11, %s3878_s11, %s3879_s12  }
  0x27   : > { %p3724_p13 = pnand %p3723_p12, %p3717_p9 }
  0x29   : > { %3727 = shalt.err (!%p3724_p13)
}
  0x2a   : > { %s4813_s3 = sld [smem:[#allocation87_spill]]  ;;  %s3739_s18 = scalar_lea.vmem %s229_s9, 640 }
  0x2b   : > { %p3740_p0 = scmp.ne.s32.totalorder %s229_s9, %s3739_s18  ;;  %p3747_p6 = scmp.lt.s32.totalorder %s229_s9, %s229_s9 }
  0x2c   : > { %p3748_p9 = scmp.lt.s32.totalorder %s3739_s18, %s3739_s18 }
  0x2d   : > { %p3742_p2 = pnand %p3740_p0, %p3678_p8 }
  0x2e   : > { %p3749_p10 = por %p3748_p9, %p3747_p6 }
  0x2f   : > { %p3743_p3 = pneg %p3742_p2 }
  0x30   : > { %3196 = dma.hbm_to_vmem [thread:$0]  (!%p3969_p7), %s4813_s3, 16384, %s216_s7, [#allocation10], %s3878_s11, %s3878_s11, %s3879_s12  }
  0x31   : > { %p3750_p11 = pnand %p3749_p10, %p3743_p3 }
  0x33   : > { %3753 = shalt.err (!%p3750_p11)
}
  0x34   : > { %s3880_s28 = smov 128   ;;  %s3881_s29 = smov 8  }
  0x35   : > { %s4814_s4 = sld [smem:[#allocation88_spill]]  ;;  %s43_s8 = sadd.s32 1, %s3861_s20 }
  0x36   : > { %s34_s10 = sadd.s32 1, %s3869_s22  ;;  %p50_p8 = scmp.ne.s32.totalorder %s3861_s20, %s3857_s19 }
  0x37   : > { %p36_p12 = scmp.ge.s32.totalorder %s34_s10, 2  ;;  %p51_p13 = scmp.eq.s32.totalorder %s3873_s23, 0 }
  0x38   : > { %p3210_p0 = scmp.lt.s32.totalorder %s3873_s23, 2  ;;  %s4012_s13 = sand.u32 1, %s3861_s20  }
  0x39   : > { %s4962_s10 = smov (%p36_p12, %s34_s10), 0  ;;  %p52_p2 = por %p51_p13, %p50_p8 }
  0x3a   : > { %s38_s30 = ssub.s32 %s3869_s22, %s4962_s10  ;;  %s3172_s14 = smul.u32 768, %s3869_s22 }
  0x3b   : > { %3199 = dma.hbm_to_vmem [thread:$0]  (!%p3969_p7), %s4814_s4, 640, %s229_s9, [#allocation10], %s3880_s28, %s3880_s28, %s3881_s29  }
  0x3c   : > { %s2895_s9 = sshll.u32 %s4012_s13, 5  ;;  %p41_p7 = scmp.eq.s32.totalorder %s38_s30, 0 }
  0x3d   : > { %s246_s15 = scalar_lea.vmem [#allocation4], %s2895_s9  ;;  %s4815_s0 = sld [smem:[#allocation85_spill]] }
  0x3e   : > { %s263_s16 = sshll.u32 %s246_s15, 4  ;;  %p4030_p3 = pnand %p3210_p0, %p52_p2  ;;  %s264_s16 = int_to_ptr.vmem [resolvable:$true] %s263_s16 }
  0x3f   : > { %s4021_s17 = scalar_select %p41_p7, %s3861_s20, %s43_s8  }
  0x40   : > { %s273_s7 = sand.u32 1, %s3873_s23   ;;  %s2897_s30 = sshll.u32 %s4012_s13, 4 }
  0x41   : > { %s243_s24 = scalar_lea.sflag [#allocation5], %s4012_s13  ;;  %p3756_p6 = pneg %p4030_p3 }
  0x42   : > { %s3767_s8 = scalar_lea.vmem %s264_s16, 512  ;;  %s3882_s9 = smov [#allocation4]  }
  0x43   : > { %s261_s29 = scalar_lea.hbm %s4815_s0, %s3172_s14  ;;  %p3768_p9 = scmp.ne.s32.totalorder %s264_s16, %s3767_s8 }
  0x44   : > { %s3772_s15 = sshll.u32 %s3882_s9, 4  ;;  %s3773_s15 = int_to_ptr.vmem [resolvable:$false] %s3772_s15 }
  0x45   : > { %p3770_p10 = pnand %p3768_p9, %p3756_p6  ;;  %s3774_s18 = scalar_lea.vmem %s3773_s15, 1024 }
  0x46   : > { %p3775_p8 = scmp.lt.s32.totalorder %s264_s16, %s3773_s15  ;;  %p3776_p12 = scmp.lt.s32.totalorder %s3774_s18, %s3767_s8 }
  0x47   : > { %p3771_p11 = pneg %p3770_p10 }
  0x48   : > { %p3777_p13 = por %p3776_p12, %p3775_p8 }
  0x4a   : > { %p3778_p0 = pnand %p3777_p13, %p3771_p11 }
  0x4c   : > { %3781 = shalt.err (!%p3778_p0)
}
  0x4d   : > { %3203 = dma.hbm_to_vmem [thread:$0]  (!%p4030_p3), %s261_s29, 512, %s264_s16, %s243_s24, %s3878_s11, %s3878_s11, %s3879_s12  }
  0x4e   : > { %s2790_s9 = scalar_lea.hbm %s4729_s1, %s3172_s14  ;;  %s277_s0 = scalar_lea.vmem [#allocation6], %s2897_s30 }
  0x4f   : > { %s289_s2 = sshll.u32 %s277_s0, 4  ;;  %s2791_s15 = scalar_lea.hbm %s2790_s9, 512  ;;  %s290_s2 = int_to_ptr.vmem [resolvable:$true] %s289_s2 }
  0x50   : > { %s274_s8 = scalar_lea.sflag [#allocation7], %s273_s7  ;;  %s3795_s18 = scalar_lea.vmem %s290_s2, 256 }
  0x51   : > { %p3796_p2 = scmp.ne.s32.totalorder %s290_s2, %s3795_s18  ;;  %s3883_s3 = smov [#allocation6]  }
  0x52   : > { %s3800_s4 = sshll.u32 %s3883_s3, 4  ;;  %s3801_s4 = int_to_ptr.vmem [resolvable:$false] %s3800_s4 }
  0x53   : > { %p3798_p7 = pnand %p3796_p2, %p3756_p6  ;;  %s3802_s24 = scalar_lea.vmem %s3801_s4, 512 }
  0x54   : > { %p3803_p10 = scmp.lt.s32.totalorder %s290_s2, %s3801_s4  ;;  %p3804_p11 = scmp.lt.s32.totalorder %s3802_s24, %s3795_s18 }
  0x55   : > { %p3799_p9 = pneg %p3798_p7 }
  0x56   : > { %p3805_p8 = por %p3804_p11, %p3803_p10 }
  0x58   : > { %p3806_p12 = pnand %p3805_p8, %p3799_p9 }
  0x5a   : > { %3809 = shalt.err (!%p3806_p12)
}
  0x5b   : > { %3206 = dma.hbm_to_vmem [thread:$0]  (!%p4030_p3), %s2791_s15, 256, %s290_s2, %s274_s8  }
  0x5c   : > { %298 = sbr.rel (%p3961_p5) target bundleno = 1026 (0x402), region = 40 }
  0x61   : > { %s300_s0 = sand.u32 1, %s3857_s19  }
  0x62   : > { %s2900_s11 = sshll.u32 %s300_s0, 5  ;;  %s301_s12 = scalar_lea.sflag [#allocation5], %s300_s0 }
  0x63   : > { %s4060_s14 = scalar_lea.vmem [#allocation4], %s2900_s11 }
  0x64   : > { %3836 = dma.done.wait (%p3957_p4), %s301_s12, 512  }
  0x65   : > { %3838 = vsyncadd (%p3957_p4), %s301_s12, 4294966784  ;;  %s4817_s3 = sadd.s32 4294967295, %s3873_s23   ;;  %s2901_s2 = sshll.u32 %s300_s0, 4 }
  0x66   : > { %s309_s4 = sand.u32 1, %s4817_s3   ;;  %s4068_s27 = scalar_lea.vmem [#allocation6], %s2901_s2 }
  0x67   : > { %s310_s16 = scalar_lea.sflag [#allocation7], %s309_s4 }
  0x68   : > { %3840 = dma.done.wait (%p3957_p4), %s310_s16, 256  }
  0x69   : > { %3842 = vsyncadd (%p3957_p4), %s310_s16, 4294967040 }
  0x6a   : > { %3844 = dma.done.wait (%p3949_p1), [#allocation7], 16384  }
  0x6b   : > { %3846 = vsyncadd (%p3949_p1), [#allocation7], 4294950912 }
  0x6c   : > { %3848 = dma.done.wait (%p3949_p1), [#allocation10], 17024  }
  0x6d   : > { %3850 = vsyncadd (%p3949_p1), [#allocation10], 4294950272  ;;  %vm451_vm0 = vcmask 1045504   ;;  %vm402_vm1 = vcmask 1046528   ;;  %vm380_vm2 = vcmask 261120   ;;  %v4087_v7 = vld [vmem:[%s4060_s14 + $0x10] sm:$0xff] }
  0x6e   : > { %v443_v0 = vld [vmem:[%s4060_s14] sm:$0xfc]  ;;  %v445_v1 = vld [vmem:[%s4060_s14 + $0x10] sm:$0x3]  ;;  %v444_v2 = vld [vmem:[%s4060_s14 + $0x8] sm:$0xfc] }
  0x6f   : > { %v452_v3 = vrot.slane %v443_v0, 2  ;;  %v453_v4 = vrot.slane %v445_v1, 2  ;;  %v446_v5 = vld [vmem:[%s4060_s14 + $0x18] sm:$0x3]  ;;  %v455_v6 = vrot.slane %v444_v2, 2  ;;  %379 = vst [vmem:[#allocation2] sm:$0xff] %v4087_v7 }
  0x70   : > { %v456_v8 = vrot.slane %v446_v5, 2  ;;  %v395_v9 = vld [vmem:[%s4060_s14 + $0x8] sm:$0xfe]  ;;  %v397_v10 = vld [vmem:[%s4060_s14 + $0x18] sm:$0x1]  ;;  %v382_v11 = vld [vmem:[%s4068_s27] sm:$0xff] }
  0x71   : > { %v454_v12 = vsel %vm451_vm0, %v452_v3, %v453_v4  ;;  %v406_v13 = vrot.slane %v395_v9, 1  ;;  %v407_v14 = vrot.slane %v397_v10, 1  ;;  %v394_v15 = vld [vmem:[%s4060_s14] sm:$0xfe]  ;;  %v396_v16 = vld [vmem:[%s4060_s14 + $0x10] sm:$0x1] }
  0x72   : > { %384 = vst [vmem:[#allocation2 + $0x10] sm:$0xff] %v382_v11  ;;  %s3884_s25 = smov 64   ;;  %v378_v17 = vld [vmem:[%s4060_s14 + $0x18] sm:$0xff]  ;;  %v457_v19 = vsel %vm451_vm0, %v455_v6, %v456_v8  ;;  %v403_v21 = vrot.slane %v394_v15, 1  ;;  %v404_v22 = vrot.slane %v396_v16, 1  ;;  %s3885_s26 = smov 32  }
  0x73   : > { %458 = vrot.lane.b32.xlu0 %v454_v12, %s3884_s25  ;;  %v383_v18 = vld [vmem:[%s4068_s27 + $0x8] sm:$0xff]  ;;  %v408_v20 = vsel %vm402_vm1, %v406_v13, %v407_v14  ;;  %381 = vst.msk [vmem:[#allocation2 + $0x8] sm:$0xff] %vm380_vm2, %v378_v17  ;;  %v492_v23 = vld [vmem:[%s4060_s14] sm:$0xf8]  ;;  %v493_v26 = vld [vmem:[%s4060_s14 + $0x10] sm:$0x7] }
  0x74   : > { %385 = vst.msk [vmem:[#allocation2 + $0x18] sm:$0xff] %vm380_vm2, %v383_v18  ;;  %411 = vrot.lane.b32.xlu1 %v408_v20, %s3885_s26  ;;  %v3272_v24 = vld [vmem:[#allocation9 + $0xe4] ss:$16 sps:$4 sm:$0xff]   ;;  %v3274_v25 = vld [vmem:[#allocation9 + $0xe0] ss:$16 sps:$4 sm:$0xff]   ;;  %v405_v29 = vsel %vm402_vm1, %v403_v21, %v404_v22  ;;  %v497_v39 = vrot.slane %v492_v23, 3 }
  0x75   : > { %v3275_v27 = vld [vmem:[#allocation9 + $0xc4] ss:$16 sps:$4 sm:$0xff]   ;;  %1444 = vmatprep.subr.bf16.mxu0 %v3272_v24  ;;  %v3277_v28 = vld [vmem:[#allocation9 + $0xc0] ss:$16 sps:$4 sm:$0xff]   ;;  %v498_v40 = vrot.slane %v493_v26, 3  ;;  %vm496_vm3 = vcmask 1044480  }
  0x76   : > { %v469_v30 = vld [vmem:[#allocation2] sm:$0xfc]  ;;  %1445 = vmatpush1.bf16.msra.mxu0 %v3274_v25  ;;  %s3886_s29 = smov 96   ;;  %vm418_vm4 = vcmask 523264   ;;  %vm467_vm5 = vcmask 785408   ;;  %vm416_vm6 = vcmask 1047808  }
  0x77   : > { %460 = vrot.lane.b32.xlu0 %v457_v19, %s3884_s25  ;;  %v420_v31 = vld [vmem:[#allocation2] sm:$0xfe]  ;;  %v477_v34 = vrot.slane %v469_v30, 2  ;;  %1446 = vmatprep.subr.bf16.mxu0 %v3275_v27  ;;  %v499_v59 = vsel %vm496_vm3, %v497_v39, %v498_v40  ;;  %vm465_vm7 = vcmask 1048064   ;;  %vm503_vm8 = vcmask 1048320   ;;  %p368_p1 = scmp.lt.s32.totalorder %s3865_s21, 1 }
  0x78   : > { %v3278_v32 = vld [vmem:[#allocation9 + $0xa4] ss:$16 sps:$4 sm:$0xff]   ;;  %v428_v36 = vrot.slane %v420_v31, 1  ;;  %v3282_v55 = vld [vmem:[#allocation9 + $0xa0] ss:$16 sps:$4 sm:$0xff]   ;;  %vm2735_vm9 = vcmask 130048  }
  0x79   : > { %v471_v33 = vld [vmem:[#allocation2 + $0x10] sm:$0x3]  ;;  %v505_v51 = vld [vmem:[#allocation2] sm:$0xf8]  ;;  %s4964_s21 = smov (!%p368_p1, %s3865_s21), 1 }
  0x7a   : > { %v422_v35 = vld [vmem:[#allocation2 + $0x10] sm:$0x1]  ;;  %v478_v37 = vrot.slane %v471_v33, 2  ;;  %v470_v41 = vld [vmem:[#allocation2 + $0x8] sm:$0xfc]  ;;  %1447 = vmatpush1.bf16.msra.mxu0 %v3277_v28  ;;  %v509_v0 = vrot.slane %v505_v51, 3 }
  0x7b   : > { %v429_v38 = vrot.slane %v422_v35, 1  ;;  %409 = vrot.lane.b32.xlu0 %v405_v29, %s3885_s26  ;;  %v472_v42 = vld [vmem:[#allocation2 + $0x18] sm:$0x3]  ;;  %v421_v43 = vld [vmem:[#allocation2 + $0x8] sm:$0xfe]  ;;  %v480_v45 = vrot.slane %v470_v41, 2  ;;  %1448 = vmatprep.subr.bf16.mxu0 %v3278_v32 }
  0x7c   : > { %v479_v44 = vsel %vm451_vm0, %v477_v34, %v478_v37  ;;  %v481_v46 = vrot.slane %v472_v42, 2  ;;  %v423_v48 = vld [vmem:[#allocation2 + $0x18] sm:$0x1]  ;;  %v431_v49 = vrot.slane %v421_v43, 1  ;;  %v506_v52 = vld [vmem:[#allocation2 + $0x10] sm:$0x7] }
  0x7d   : > { %v430_v47 = vsel %vm402_vm1, %v428_v36, %v429_v38  ;;  %483 = vrot.lane.b32.xlu1 %v479_v44, %s3884_s25  ;;  %v432_v50 = vrot.slane %v423_v48, 1  ;;  %v3280_v53 = vld [vmem:[#allocation9 + $0x2e4] ss:$16 sps:$4 sm:$0xff]   ;;  %v3283_v56 = vld [vmem:[#allocation9 + $0x2e0] ss:$16 sps:$4 sm:$0xff]   ;;  %v510_v1 = vrot.slane %v506_v52, 3 }
  0x7e   : > { %v482_v54 = vsel %vm451_vm0, %v480_v45, %v481_v46  ;;  %v3284_v57 = vld [vmem:[#allocation9 + $0x84] ss:$16 sps:$4 sm:$0xff]   ;;  %1487 = vmatprep.subr.bf16.mxu1 %v3280_v53  ;;  %1449 = vmatpush1.bf16.msra.mxu0 %v3282_v55  ;;  %v3288_v60 = vld [vmem:[#allocation9 + $0x80] ss:$16 sps:$4 sm:$0xff]   ;;  %v387_v28 = vld [vmem:[%s4060_s14 + $0x8] sm:$0xff]  ;;  %s3173_s6 = smul.u32 40, %s4964_s21 }
  0x7f   : > { %434 = vrot.lane.b32.xlu0 %v430_v47, %s3885_s26  ;;  %v3286_v58 = vld [vmem:[#allocation9 + $0x2c4] ss:$16 sps:$4 sm:$0xff]   ;;  %1488 = vmatpush1.bf16.msra.mxu1 %v3283_v56  ;;  %v3289_v61 = vld [vmem:[#allocation9 + $0x2c0] ss:$16 sps:$4 sm:$0xff]   ;;  %v433_v63 = vsel %vm402_vm1, %v431_v49, %v432_v50  ;;  %v511_v6 = vsel %vm496_vm3, %v509_v0, %v510_v1  ;;  %389 = vst.msk [vmem:[#allocation3 + $0x8] sm:$0xff] %vm380_vm2, %v387_v28  ;;  %v391_v32 = vld [vmem:[#allocation2 + $0x8] sm:$0xff] }
  0x80   : > { %1450 = vmatprep.subr.bf16.mxu0 %v3284_v57  ;;  %v3290_v62 = vld [vmem:[#allocation9 + $0x64] ss:$16 sps:$4 sm:$0xff]   ;;  %1489 = vmatprep.subr.bf16.mxu1 %v3286_v58  ;;  %v3294_v3 = vld [vmem:[#allocation9 + $0x60] ss:$16 sps:$4 sm:$0xff]   ;;  %393 = vst.msk [vmem:[#allocation3 + $0x28] sm:$0xff] %vm380_vm2, %v391_v32  ;;  %s375_s13 = scalar_lea.vmem %s4733_s5, %s3173_s6 }
  0x81   : > { %485 = vrot.lane.b32.xlu1 %v482_v54, %s3884_s25  ;;  %v3292_v2 = vld [vmem:[#allocation9 + $0x2a4] ss:$16 sps:$4 sm:$0xff]   ;;  %v3295_v4 = vld [vmem:[#allocation9 + $0x2a0] ss:$16 sps:$4 sm:$0xff]   ;;  %v3366_v55 = vld [vmem:[#allocation9 + $0xec] ss:$16 sps:$4 sm:$0xff]  }
  0x82   : > { %1451 = vmatpush1.bf16.msra.mxu0 %v3288_v60  ;;  %v3296_v5 = vld [vmem:[#allocation9 + $0x44] ss:$16 sps:$4 sm:$0xff]   ;;  %v3300_v9 = vld [vmem:[#allocation9 + $0x40] ss:$16 sps:$4 sm:$0xff]   ;;  %v3377_v28 = vld [vmem:[#allocation9 + $0x2e8] ss:$16 sps:$4 sm:$0xff]  }
  0x83   : > { %500 = vrot.lane.b32.xlu0 %v499_v59, %s3886_s29  ;;  %1490 = vmatpush1.bf16.msra.mxu1 %v3289_v61  ;;  %v3298_v8 = vld [vmem:[#allocation9 + $0x284] ss:$16 sps:$4 sm:$0xff]   ;;  %v3301_v10 = vld [vmem:[#allocation9 + $0x280] ss:$16 sps:$4 sm:$0xff]   ;;  %v3379_v59 = vld [vmem:[#allocation9 + $0x2ec] ss:$16 sps:$4 sm:$0xff]  }
  0x84   : > { %1452 = vmatprep.subr.bf16.mxu0 %v3290_v62  ;;  %1491 = vmatprep.subr.bf16.mxu1 %v3292_v2  ;;  %v3302_v11 = vld [vmem:[#allocation9 + $0x24] ss:$16 sps:$4 sm:$0xff]   ;;  %v3306_v13 = vld [vmem:[#allocation9 + $0x20] ss:$16 sps:$4 sm:$0xff]  }
  0x85   : > { %436 = vrot.lane.b32.xlu1 %v433_v63, %s3885_s26  ;;  %v3304_v12 = vld [vmem:[#allocation9 + $0x264] ss:$16 sps:$4 sm:$0xff]   ;;  %v3307_v14 = vld [vmem:[#allocation9 + $0x260] ss:$16 sps:$4 sm:$0xff]  }
  0x86   : > { %1453 = vmatpush1.bf16.msra.mxu0 %v3294_v3  ;;  %v3308_v15 = vld [vmem:[#allocation9 + $0x4] ss:$16 sps:$4 sm:$0xff]   ;;  %v3312_v17 = vld [vmem:[#allocation9] ss:$16 sps:$4 sm:$0xff]  }
  0x87   : > { %1492 = vmatpush1.bf16.msra.mxu1 %v3295_v4  ;;  %1454 = vmatprep.subr.bf16.mxu0 %v3296_v5  ;;  %v3310_v16 = vld [vmem:[#allocation9 + $0x244] ss:$16 sps:$4 sm:$0xff]   ;;  %v3313_v18 = vld [vmem:[#allocation9 + $0x240] ss:$16 sps:$4 sm:$0xff]  }
  0x88   : > { %1493 = vmatprep.subr.bf16.mxu1 %v3298_v8  ;;  %v3314_v19 = vld [vmem:[#allocation9 + $0x1e4] ss:$16 sps:$4 sm:$0xff]   ;;  %v3318_v21 = vld [vmem:[#allocation9 + $0x1e0] ss:$16 sps:$4 sm:$0xff]  }
  0x89   : > { %512 = vrot.lane.b32.xlu1 %v511_v6, %s3886_s29  ;;  %v3316_v20 = vld [vmem:[#allocation9 + $0x224] ss:$16 sps:$4 sm:$0xff]   ;;  %v3319_v22 = vld [vmem:[#allocation9 + $0x220] ss:$16 sps:$4 sm:$0xff]  }
  0x8a   : > { %1455 = vmatpush1.bf16.msra.mxu0 %v3300_v9  ;;  %v3320_v23 = vld [vmem:[#allocation9 + $0x1c4] ss:$16 sps:$4 sm:$0xff]   ;;  %v3324_v25 = vld [vmem:[#allocation9 + $0x1c0] ss:$16 sps:$4 sm:$0xff]  }
  0x8b   : > { %1494 = vmatpush1.bf16.msra.mxu1 %v3301_v10  ;;  %1456 = vmatprep.subr.bf16.mxu0 %v3302_v11  ;;  %v3322_v24 = vld [vmem:[#allocation9 + $0x204] ss:$16 sps:$4 sm:$0xff]   ;;  %v3325_v26 = vld [vmem:[#allocation9 + $0x200] ss:$16 sps:$4 sm:$0xff]   ;;  %v3364_v11 = vld [vmem:[#allocation9 + $0xe8] ss:$16 sps:$4 sm:$0xff]  }
  0x8c   : > { %1495 = vmatprep.subr.bf16.mxu1 %v3304_v12  ;;  %v3326_v27 = vld [vmem:[#allocation9 + $0x1a4] ss:$16 sps:$4 sm:$0xff]   ;;  %v3330_v30 = vld [vmem:[#allocation9 + $0x1a0] ss:$16 sps:$4 sm:$0xff]  }
  0x8d   : > { %v3328_v29 = vld [vmem:[#allocation9 + $0x3e4] ss:$16 sps:$4 sm:$0xff]   ;;  %v3331_v31 = vld [vmem:[#allocation9 + $0x3e0] ss:$16 sps:$4 sm:$0xff]  }
  0x8e   : > { %1457 = vmatpush1.bf16.msra.mxu0 %v3306_v13  ;;  %v3332_v33 = vld [vmem:[#allocation9 + $0x184] ss:$16 sps:$4 sm:$0xff]   ;;  %v3336_v35 = vld [vmem:[#allocation9 + $0x180] ss:$16 sps:$4 sm:$0xff]  }
  0x8f   : > { %1496 = vmatpush1.bf16.msra.mxu1 %v3307_v14  ;;  %1458 = vmatprep.subr.bf16.mxu0 %v3308_v15  ;;  %v3334_v34 = vld [vmem:[#allocation9 + $0x3c4] ss:$16 sps:$4 sm:$0xff]   ;;  %v3337_v36 = vld [vmem:[#allocation9 + $0x3c0] ss:$16 sps:$4 sm:$0xff]   ;;  %v3372_v14 = vld [vmem:[#allocation9 + $0xcc] ss:$16 sps:$4 sm:$0xff]  }
  0x90   : > { %1497 = vmatprep.subr.bf16.mxu1 %v3310_v16  ;;  %v3338_v37 = vld [vmem:[#allocation9 + $0x164] ss:$16 sps:$4 sm:$0xff]   ;;  %v3342_v39 = vld [vmem:[#allocation9 + $0x160] ss:$16 sps:$4 sm:$0xff]  }
  0x91   : > { %v3340_v38 = vld [vmem:[#allocation9 + $0x3a4] ss:$16 sps:$4 sm:$0xff]   ;;  %v3343_v40 = vld [vmem:[#allocation9 + $0x3a0] ss:$16 sps:$4 sm:$0xff]  }
  0x92   : > { %1459 = vmatpush1.bf16.msra.mxu0 %v3312_v17  ;;  %v4123_v41 = vld [vmem:[%s4060_s14] sm:$0xff] }
  0x93   : > { %1498 = vmatpush1.bf16.msra.mxu1 %v3313_v18  ;;  %1460 = vmatprep.subr.bf16.mxu0 %v3314_v19  ;;  %v3344_v42 = vld [vmem:[#allocation9 + $0x144] ss:$16 sps:$4 sm:$0xff]   ;;  %388 = vst [vmem:[#allocation3] sm:$0xff] %v4123_v41  ;;  %v3348_v44 = vld [vmem:[#allocation9 + $0x140] ss:$16 sps:$4 sm:$0xff]   ;;  %v4138_v13 = vpack.c.bf16 %v4087_v7, %v4123_v41 }
  0x94   : > { %1499 = vmatprep.subr.bf16.mxu1 %v3316_v20  ;;  %v3346_v43 = vld [vmem:[#allocation9 + $0x384] ss:$16 sps:$4 sm:$0xff]   ;;  %v3349_v45 = vld [vmem:[#allocation9 + $0x380] ss:$16 sps:$4 sm:$0xff]   ;;  %v3370_v7 = vld [vmem:[#allocation9 + $0xc8] ss:$16 sps:$4 sm:$0xff]  }
  0x95   : > { %v3350_v46 = vld [vmem:[#allocation9 + $0x124] ss:$16 sps:$4 sm:$0xff]   ;;  %v3354_v48 = vld [vmem:[#allocation9 + $0x120] ss:$16 sps:$4 sm:$0xff]   ;;  %v3376_v19 = vld [vmem:[#allocation9 + $0xac] ss:$16 sps:$4 sm:$0xff]  }
  0x96   : > { %1461 = vmatpush2.bf16.msra.mxu0 %v3318_v21  ;;  %v3352_v47 = vld [vmem:[#allocation9 + $0x364] ss:$16 sps:$4 sm:$0xff]   ;;  %v3355_v49 = vld [vmem:[#allocation9 + $0x360] ss:$16 sps:$4 sm:$0xff]   ;;  %v3383_v41 = vld [vmem:[#allocation9 + $0x2c8] ss:$16 sps:$4 sm:$0xff]  }
  0x97   : > { %1500 = vmatpush1.bf16.msra.mxu1 %v3319_v22  ;;  %1462 = vmatprep.subr.bf16.mxu0 %v3320_v23  ;;  %v3356_v50 = vld [vmem:[#allocation9 + $0x104] ss:$16 sps:$4 sm:$0xff]   ;;  %v3360_v52 = vld [vmem:[#allocation9 + $0x100] ss:$16 sps:$4 sm:$0xff]   ;;  %v3374_v22 = vld [vmem:[#allocation9 + $0xa8] ss:$16 sps:$4 sm:$0xff]  }
  0x98   : > { %1501 = vmatprep.subr.bf16.mxu1 %v3322_v24  ;;  %v3358_v51 = vld [vmem:[#allocation9 + $0x344] ss:$16 sps:$4 sm:$0xff]   ;;  %v3361_v53 = vld [vmem:[#allocation9 + $0x340] ss:$16 sps:$4 sm:$0xff]  }
  0x99   : > { %v3362_v54 = vld [vmem:[#allocation9 + $0x324] ss:$16 sps:$4 sm:$0xff]   ;;  %v3367_v56 = vld [vmem:[#allocation9 + $0x320] ss:$16 sps:$4 sm:$0xff]  }
  0x9a   : > { %1463 = vmatpush2.bf16.msra.mxu0 %v3324_v25  ;;  %v3368_v57 = vld [vmem:[#allocation9 + $0x304] ss:$16 sps:$4 sm:$0xff]   ;;  %v3373_v58 = vld [vmem:[#allocation9 + $0x300] ss:$16 sps:$4 sm:$0xff]  }
  0x9b   : > { %1502 = vmatpush1.bf16.msra.mxu1 %v3325_v26  ;;  %1464 = vmatprep.subr.bf16.mxu0 %v3326_v27  ;;  %v3382_v27 = vld [vmem:[#allocation9 + $0x8c] ss:$16 sps:$4 sm:$0xff]  }
  0x9c   : > { %1503 = vmatprep.subr.bf16.mxu1 %v3328_v29 }
  0x9e   : > { %1465 = vmatpush2.bf16.msra.mxu0 %v3330_v30 }
  0x9f   : > { %1504 = vmatpush2.bf16.msra.mxu1 %v3331_v31  ;;  %1466 = vmatprep.subr.bf16.mxu0 %v3332_v33 }
  0xa0   : > { %1505 = vmatprep.subr.bf16.mxu1 %v3334_v34  ;;  %v3385_v34 = vld [vmem:[#allocation9 + $0x2cc] ss:$16 sps:$4 sm:$0xff]  }
  0xa2   : > { %1467 = vmatpush2.bf16.msra.mxu0 %v3336_v35  ;;  %v3380_v35 = vld [vmem:[#allocation9 + $0x88] ss:$16 sps:$4 sm:$0xff]  }
  0xa3   : > { %1506 = vmatpush2.bf16.msra.mxu1 %v3337_v36  ;;  %1468 = vmatprep.subr.bf16.mxu0 %v3338_v37  ;;  %v3388_v36 = vld [vmem:[#allocation9 + $0x6c] ss:$16 sps:$4 sm:$0xff]  }
  0xa4   : > { %1507 = vmatprep.subr.bf16.mxu1 %v3340_v38 }
  0xa6   : > { %1469 = vmatpush2.bf16.msra.mxu0 %v3342_v39 }
  0xa7   : > { %1508 = vmatpush2.bf16.msra.mxu1 %v3343_v40  ;;  %1470 = vmatprep.subr.bf16.mxu0 %v3344_v42  ;;  %v3386_v42 = vld [vmem:[#allocation9 + $0x68] ss:$16 sps:$4 sm:$0xff]  }
  0xa8   : > { %1509 = vmatprep.subr.bf16.mxu1 %v3346_v43  ;;  %v3391_v43 = vld [vmem:[#allocation9 + $0x2ac] ss:$16 sps:$4 sm:$0xff]  }
  0xaa   : > { %1471 = vmatpush2.bf16.msra.mxu0 %v3348_v44 }
  0xab   : > { %1510 = vmatpush2.bf16.msra.mxu1 %v3349_v45  ;;  %1472 = vmatprep.subr.bf16.mxu0 %v3350_v46 }
  0xac   : > { %1511 = vmatprep.subr.bf16.mxu1 %v3352_v47  ;;  %v3394_v47 = vld [vmem:[#allocation9 + $0x4c] ss:$16 sps:$4 sm:$0xff]  }
  0xae   : > { %1473 = vmatpush2.bf16.msra.mxu0 %v3354_v48 }
  0xaf   : > { %1512 = vmatpush2.bf16.msra.mxu1 %v3355_v49  ;;  %1474 = vmatprep.subr.bf16.mxu0 %v3356_v50  ;;  %v3389_v49 = vld [vmem:[#allocation9 + $0x2a8] ss:$16 sps:$4 sm:$0xff]  }
  0xb0   : > { %1513 = vmatprep.subr.bf16.mxu1 %v3358_v51  ;;  %v3392_v50 = vld [vmem:[#allocation9 + $0x48] ss:$16 sps:$4 sm:$0xff]   ;;  %v3397_v51 = vld [vmem:[#allocation9 + $0x28c] ss:$16 sps:$4 sm:$0xff]  }
  0xb2   : > { %1475 = vmatpush2.bf16.msra.mxu0 %v3360_v52  ;;  %v3400_v52 = vld [vmem:[#allocation9 + $0x2c] ss:$16 sps:$4 sm:$0xff]  }
  0xb3   : > { %1514 = vmatpush2.bf16.msra.mxu1 %v3361_v53  ;;  %1530 = vmatprep.subr.bf16.mxu0 %v3366_v55  ;;  %v3395_v53 = vld [vmem:[#allocation9 + $0x288] ss:$16 sps:$4 sm:$0xff]   ;;  %v3403_v55 = vld [vmem:[#allocation9 + $0x26c] ss:$16 sps:$4 sm:$0xff]  }
  0xb4   : > { %1515 = vmatprep.subr.bf16.mxu1 %v3362_v54  ;;  %v3398_v54 = vld [vmem:[#allocation9 + $0x28] ss:$16 sps:$4 sm:$0xff]  }
  0xb7   : > { %1516 = vmatpush2.bf16.msra.mxu1 %v3367_v56  ;;  %v3406_v56 = vld [vmem:[#allocation9 + $0xc] ss:$16 sps:$4 sm:$0xff]  }
  0xb8   : > { %1517 = vmatprep.subr.bf16.mxu1 %v3368_v57  ;;  %v3401_v57 = vld [vmem:[#allocation9 + $0x268] ss:$16 sps:$4 sm:$0xff]  }
  0xbb   : > { %1518 = vmatpush2.bf16.msra.mxu1 %v3373_v58  ;;  %v3404_v58 = vld [vmem:[#allocation9 + $0x8] ss:$16 sps:$4 sm:$0xff]  }
  0xbc   : > { %1573 = vmatprep.subr.bf16.mxu1 %v3379_v59  ;;  %v3409_v59 = vld [vmem:[#allocation9 + $0x24c] ss:$16 sps:$4 sm:$0xff]  }
  0xe5   : > { %v459_v60 = vpop.permute.xlu0 %458 }
  0xe6   : > { %v412_v62 = vpop.permute.xlu1 %411 }
  0xe9   : > { %v461_v61 = vpop.permute.xlu0 %460 }
  0xea   : > { %v462_v63 = vsel %vm418_vm4, %v459_v60, %v461_v61  ;;  %v3407_v61 = vld [vmem:[#allocation9 + $0x248] ss:$16 sps:$4 sm:$0xff]  }
  0xeb   : > { %468 = vst.msk [vmem:[#allocation3 + $0x18] sm:$0xff] %vm467_vm5, %v462_v63  ;;  %v3415_v63 = vld [vmem:[#allocation9 + $0x22c] ss:$16 sps:$4 sm:$0xff]  }
  0xed   : > { %v410_v0 = vpop.permute.xlu0 %409 }
  0xee   : > { %v413_v1 = vsel %vm380_vm2, %v410_v0, %v412_v62  ;;  %417 = vst.msk [vmem:[#allocation3 + $0x8] sm:$0xff] %vm416_vm6, %v410_v0  ;;  %v3410_v62 = vld [vmem:[#allocation9 + $0x1e8] ss:$16 sps:$4 sm:$0xff]   ;;  %v3418_v0 = vld [vmem:[#allocation9 + $0x1cc] ss:$16 sps:$4 sm:$0xff]  }
  0xef   : > { %419 = vst.msk [vmem:[#allocation3 + $0x10] sm:$0xff] %vm418_vm4, %v413_v1  ;;  %v484_v2 = vpop.permute.xlu1 %483  ;;  %v3413_v1 = vld [vmem:[#allocation9 + $0x228] ss:$16 sps:$4 sm:$0xff]  }
  0xf0   : > { %466 = vst.msk [vmem:[#allocation3 + $0x10] sm:$0xff] %vm465_vm7, %v459_v60  ;;  %v3412_v60 = vld [vmem:[#allocation9 + $0x1ec] ss:$16 sps:$4 sm:$0xff]  }
  0xf1   : > { %v435_v3 = vpop.permute.xlu0 %434 }
  0xf2   : > { %441 = vst.msk [vmem:[#allocation3 + $0x28] sm:$0xff] %vm416_vm6, %v435_v3 }
  0xf3   : > { %v486_v4 = vpop.permute.xlu1 %485 }
  0xf4   : > { %v487_v5 = vsel %vm418_vm4, %v484_v2, %v486_v4  ;;  %v3424_v4 = vld [vmem:[#allocation9 + $0x1ac] ss:$16 sps:$4 sm:$0xff]  }
  0xf5   : > { %491 = vst.msk [vmem:[#allocation3 + $0x38] sm:$0xff] %vm467_vm5, %v487_v5  ;;  %v501_v6 = vpop.permute.xlu0 %500  ;;  %v517_v9 = vld [vmem:[#allocation3 + $0x8] sm:$0xff] }
  0xf6   : > { %504 = vst.msk [vmem:[#allocation3 + $0x18] sm:$0xff] %vm503_vm8, %v501_v6  ;;  %v3419_v5 = vld [vmem:[#allocation9 + $0x208] ss:$16 sps:$4 sm:$0xff]   ;;  %v3427_v6 = vld [vmem:[#allocation9 + $0x3ec] ss:$16 sps:$4 sm:$0xff]  }
  0xf7   : > { %v437_v8 = vpop.permute.xlu1 %436  ;;  %v518_v25 = vld [vmem:[#allocation3 + $0x10] sm:$0xff] }
  0xf8   : > { %v438_v10 = vsel %vm380_vm2, %v435_v3, %v437_v8  ;;  %v3416_v3 = vld [vmem:[#allocation9 + $0x1c8] ss:$16 sps:$4 sm:$0xff]  }
  0xf9   : > { %442 = vst.msk [vmem:[#allocation3 + $0x30] sm:$0xff] %vm418_vm4, %v438_v10  ;;  %v521_v12 = vld [vmem:[#allocation3 + $0x28] sm:$0xff] }
  0xfa   : > { %490 = vst.msk [vmem:[#allocation3 + $0x30] sm:$0xff] %vm465_vm7, %v484_v2  ;;  %v4141_v15 = vpack.c.bf16 %v521_v12, %v517_v9  ;;  %v3421_v2 = vld [vmem:[#allocation9 + $0x20c] ss:$16 sps:$4 sm:$0xff]   ;;  %v3422_v8 = vld [vmem:[#allocation9 + $0x1a8] ss:$16 sps:$4 sm:$0xff]  }
  0xfb   : > { %v513_v16 = vpop.permute.xlu1 %512  ;;  %v3425_v10 = vld [vmem:[#allocation9 + $0x3e8] ss:$16 sps:$4 sm:$0xff]  }
  0xfc   : > { %515 = vst.msk [vmem:[#allocation3 + $0x38] sm:$0xff] %vm503_vm8, %v513_v16  ;;  %1476 = vmatprep.mubr.bf16.mxu0 %v4141_v15  ;;  %v529_v17 = vunpack.c.l.bf16 %v4141_v15  ;;  %v533_v18 = vunpack.c.h.bf16 %v4141_v15  ;;  %v3431_v16 = vld [vmem:[#allocation9 + $0x3c8] ss:$16 sps:$4 sm:$0xff]  }
  0xfd   : > { %1477 = vmatmul.mubr.bf16.vlgmr.msra.gmra.mxu0 %v4138_v13  ;;  %v519_v24 = vld [vmem:[#allocation3 + $0x18] sm:$0xff] }
  0xfe   : > { %1531 = vmatpush1.bf16.msra.mxu0 %v3364_v11  ;;  %1562 = vmatprep.mubr.bf16.mxu0 %v4141_v15  ;;  %v537_v20 = vsub.f32 %v517_v9, %v529_v17  ;;  %v541_v21 = vsub.f32 %v521_v12, %v533_v18  ;;  %v3430_v9 = vld [vmem:[#allocation9 + $0x18c] ss:$16 sps:$4 sm:$0xff]   ;;  %v3428_v12 = vld [vmem:[#allocation9 + $0x188] ss:$16 sps:$4 sm:$0xff]  }
  0xff   : > { %1532 = vmatprep.subr.bf16.mxu0 %v3372_v14  ;;  %v3433_v11 = vld [vmem:[#allocation9 + $0x3cc] ss:$16 sps:$4 sm:$0xff]   ;;  %v3434_v18 = vld [vmem:[#allocation9 + $0x168] ss:$16 sps:$4 sm:$0xff]  }
 0x100   : > { %v4149_v23 = vpack.c.bf16 %v541_v21, %v537_v20  ;;  %v3436_v14 = vld [vmem:[#allocation9 + $0x16c] ss:$16 sps:$4 sm:$0xff]   ;;  %v3440_v21 = vld [vmem:[#allocation9 + $0x148] ss:$16 sps:$4 sm:$0xff]  }
 0x101   : > { %v522_v26 = vld [vmem:[#allocation3 + $0x30] sm:$0xff]  ;;  %v3439_v17 = vld [vmem:[#allocation9 + $0x3ac] ss:$16 sps:$4 sm:$0xff]  }
 0x102   : > { %1533 = vmatpush1.bf16.msra.mxu0 %v3370_v7  ;;  %v4151_v29 = vpack.c.bf16 %v522_v26, %v518_v25  ;;  %v3442_v7 = vld [vmem:[#allocation9 + $0x14c] ss:$16 sps:$4 sm:$0xff]  }
 0x103   : > { %v523_v30 = vld [vmem:[#allocation3 + $0x38] sm:$0xff]  ;;  %1534 = vmatprep.subr.bf16.mxu0 %v3376_v19 }
 0x104   : > { %v4153_v31 = vpack.c.bf16 %v523_v30, %v519_v24  ;;  %v530_v32 = vunpack.c.l.bf16 %v4151_v29  ;;  %v534_v33 = vunpack.c.h.bf16 %v4151_v29  ;;  %v3437_v19 = vld [vmem:[#allocation9 + $0x3a8] ss:$16 sps:$4 sm:$0xff]   ;;  %v3445_v20 = vld [vmem:[#allocation9 + $0x38c] ss:$16 sps:$4 sm:$0xff]  }
 0x106   : > { %1519 = vmatprep.mubr.bf16.mxu1 %v4153_v31  ;;  %1535 = vmatpush1.bf16.msra.mxu0 %v3374_v22  ;;  %v531_v37 = vunpack.c.l.bf16 %v4153_v31  ;;  %v535_v38 = vunpack.c.h.bf16 %v4153_v31  ;;  %v538_v39 = vsub.f32 %v518_v25, %v530_v32  ;;  %v542_v40 = vsub.f32 %v522_v26, %v534_v33  ;;  %v3448_v22 = vld [vmem:[#allocation9 + $0x12c] ss:$16 sps:$4 sm:$0xff]   ;;  %v3446_v26 = vld [vmem:[#allocation9 + $0x128] ss:$16 sps:$4 sm:$0xff]   ;;  %v4166_v33 = vld [vmem:[#allocation8 + $0xe4] ss:$16 sps:$4 sm:$0xff]  }
 0x107   : > { %1520 = vmatmul.mubr.bf16.vlgmr.msra.gmra.mxu1 %v4151_v29  ;;  %1536 = vmatprep.subr.bf16.mxu0 %v3382_v27  ;;  %v3451_v25 = vld [vmem:[#allocation9 + $0x36c] ss:$16 sps:$4 sm:$0xff]   ;;  %v3452_v32 = vld [vmem:[#allocation9 + $0x108] ss:$16 sps:$4 sm:$0xff]  }
 0x108   : > { %1574 = vmatpush1.bf16.msra.mxu1 %v3377_v28  ;;  %1605 = vmatprep.mubr.bf16.mxu1 %v4153_v31  ;;  %v539_v44 = vsub.f32 %v519_v24, %v531_v37  ;;  %v543_v45 = vsub.f32 %v523_v30, %v535_v38  ;;  %v4162_v46 = vpack.c.bf16 %v542_v40, %v538_v39  ;;  %v3443_v24 = vld [vmem:[#allocation9 + $0x388] ss:$16 sps:$4 sm:$0xff]   ;;  %v3454_v27 = vld [vmem:[#allocation9 + $0x10c] ss:$16 sps:$4 sm:$0xff]   ;;  %v4171_v37 = vld [vmem:[#allocation8 + $0xc4] ss:$16 sps:$4 sm:$0xff]  }
 0x109   : > { %1575 = vmatprep.subr.bf16.mxu1 %v3385_v34  ;;  %v3449_v28 = vld [vmem:[#allocation9 + $0x368] ss:$16 sps:$4 sm:$0xff]   ;;  %v3457_v30 = vld [vmem:[#allocation9 + $0x34c] ss:$16 sps:$4 sm:$0xff]   ;;  %v4176_v40 = vld [vmem:[#allocation8 + $0xc0] ss:$16 sps:$4 sm:$0xff]  }
 0x10a   : > { %4818 = vst [vmem:[#allocation16_spill] sm:$0xff] %v4162_v46  ;;  %1537 = vmatpush1.bf16.msra.mxu0 %v3380_v35  ;;  %v4164_v48 = vpack.c.bf16 %v543_v45, %v539_v44  ;;  %v3455_v34 = vld [vmem:[#allocation9 + $0x348] ss:$16 sps:$4 sm:$0xff]   ;;  %v3460_v35 = vld [vmem:[#allocation9 + $0x32c] ss:$16 sps:$4 sm:$0xff]  }
 0x10b   : > { %1538 = vmatprep.subr.bf16.mxu0 %v3388_v36  ;;  %v4168_v36 = vld [vmem:[#allocation8 + $0xe0] ss:$16 sps:$4 sm:$0xff]   ;;  %v3458_v38 = vld [vmem:[#allocation9 + $0x328] ss:$16 sps:$4 sm:$0xff]   ;;  %v3466_v39 = vld [vmem:[#allocation9 + $0x30c] ss:$16 sps:$4 sm:$0xff]  }
 0x10c   : > { %1576 = vmatpush1.bf16.msra.mxu1 %v3383_v41  ;;  %v4179_v41 = vld [vmem:[#allocation8 + $0xa4] ss:$16 sps:$4 sm:$0xff]   ;;  %v4184_v44 = vld [vmem:[#allocation8 + $0xa0] ss:$16 sps:$4 sm:$0xff]  }
 0x10d   : > { %1577 = vmatprep.subr.bf16.mxu1 %v3391_v43  ;;  %v4181_v43 = vld [vmem:[#allocation8 + $0x2e4] ss:$16 sps:$4 sm:$0xff]  }
 0x10e   : > { %1539 = vmatpush1.bf16.msra.mxu0 %v3386_v42  ;;  %v3464_v42 = vld [vmem:[#allocation9 + $0x308] ss:$16 sps:$4 sm:$0xff]   ;;  %v4187_v45 = vld [vmem:[#allocation8 + $0x84] ss:$16 sps:$4 sm:$0xff]  }
 0x10f   : > { %1540 = vmatprep.subr.bf16.mxu0 %v3394_v47  ;;  %v4189_v47 = vld [vmem:[#allocation8 + $0x2e0] ss:$16 sps:$4 sm:$0xff]   ;;  %v4338_v46 = vld [vmem:[#allocation8 + $0x344] ss:$16 sps:$4 sm:$0xff]  }
 0x110   : > { %1578 = vmatpush1.bf16.msra.mxu1 %v3389_v49  ;;  %v4192_v49 = vld [vmem:[#allocation8 + $0x2c4] ss:$16 sps:$4 sm:$0xff]   ;;  %4827 = vst [vmem:[#allocation25_spill] sm:$0xff] %v4338_v46 }
 0x111   : > { %1579 = vmatprep.subr.bf16.mxu1 %v3397_v51  ;;  %v4199_v51 = vld [vmem:[#allocation8 + $0x64] ss:$16 sps:$4 sm:$0xff]  }
 0x112   : > { %1541 = vmatpush1.bf16.msra.mxu0 %v3392_v50  ;;  %v4195_v50 = vld [vmem:[#allocation8 + $0x80] ss:$16 sps:$4 sm:$0xff]  }
 0x113   : > { %1542 = vmatprep.subr.bf16.mxu0 %v3400_v52  ;;  %v4203_v52 = vld [vmem:[#allocation8 + $0x2c0] ss:$16 sps:$4 sm:$0xff]  }
 0x114   : > { %1580 = vmatpush1.bf16.msra.mxu1 %v3395_v53  ;;  %v4206_v53 = vld [vmem:[#allocation8 + $0x2a4] ss:$16 sps:$4 sm:$0xff]  }
 0x115   : > { %1581 = vmatprep.subr.bf16.mxu1 %v3403_v55  ;;  %v4212_v55 = vld [vmem:[#allocation8 + $0x44] ss:$16 sps:$4 sm:$0xff]  }
 0x116   : > { %1543 = vmatpush1.bf16.msra.mxu0 %v3398_v54  ;;  %v4209_v54 = vld [vmem:[#allocation8 + $0x60] ss:$16 sps:$4 sm:$0xff]  }
 0x117   : > { %1544 = vmatprep.subr.bf16.mxu0 %v3406_v56  ;;  %v4215_v56 = vld [vmem:[#allocation8 + $0x2a0] ss:$16 sps:$4 sm:$0xff]  }
 0x118   : > { %1582 = vmatpush1.bf16.msra.mxu1 %v3401_v57  ;;  %v4218_v57 = vld [vmem:[#allocation8 + $0x284] ss:$16 sps:$4 sm:$0xff]  }
 0x119   : > { %1583 = vmatprep.subr.bf16.mxu1 %v3409_v59  ;;  %v4224_v59 = vld [vmem:[#allocation8 + $0x24] ss:$16 sps:$4 sm:$0xff]  }
 0x11a   : > { %1545 = vmatpush1.bf16.msra.mxu0 %v3404_v58  ;;  %v4221_v58 = vld [vmem:[#allocation8 + $0x40] ss:$16 sps:$4 sm:$0xff]  }
 0x11b   : > { %1546 = vmatprep.subr.bf16.mxu0 %v3412_v60  ;;  %v4227_v60 = vld [vmem:[#allocation8 + $0x280] ss:$16 sps:$4 sm:$0xff]  }
 0x11c   : > { %1584 = vmatpush1.bf16.msra.mxu1 %v3407_v61  ;;  %v4230_v61 = vld [vmem:[#allocation8 + $0x264] ss:$16 sps:$4 sm:$0xff]  }
 0x11d   : > { %1585 = vmatprep.subr.bf16.mxu1 %v3415_v63  ;;  %v4236_v63 = vld [vmem:[#allocation8 + $0x4] ss:$16 sps:$4 sm:$0xff]  }
 0x11e   : > { %1547 = vmatpush2.bf16.msra.mxu0 %v3410_v62  ;;  %v4233_v62 = vld [vmem:[#allocation8 + $0x20] ss:$16 sps:$4 sm:$0xff]  }
 0x11f   : > { %1548 = vmatprep.subr.bf16.mxu0 %v3418_v0  ;;  %v4239_v0 = vld [vmem:[#allocation8 + $0x260] ss:$16 sps:$4 sm:$0xff]  }
 0x120   : > { %1586 = vmatpush1.bf16.msra.mxu1 %v3413_v1  ;;  %v4242_v1 = vld [vmem:[#allocation8 + $0x244] ss:$16 sps:$4 sm:$0xff]  }
 0x121   : > { %1587 = vmatprep.subr.bf16.mxu1 %v3421_v2  ;;  %v4245_v2 = vld [vmem:[#allocation8] ss:$16 sps:$4 sm:$0xff]  }
 0x122   : > { %1549 = vmatpush2.bf16.msra.mxu0 %v3416_v3  ;;  %v4248_v3 = vld [vmem:[#allocation8 + $0x1e4] ss:$16 sps:$4 sm:$0xff]  }
 0x123   : > { %1550 = vmatprep.subr.bf16.mxu0 %v3424_v4  ;;  %v4251_v4 = vld [vmem:[#allocation8 + $0x240] ss:$16 sps:$4 sm:$0xff]  }
 0x124   : > { %1588 = vmatpush1.bf16.msra.mxu1 %v3419_v5  ;;  %v4254_v5 = vld [vmem:[#allocation8 + $0x224] ss:$16 sps:$4 sm:$0xff]  }
 0x125   : > { %1589 = vmatprep.subr.bf16.mxu1 %v3427_v6  ;;  %v4257_v6 = vld [vmem:[#allocation8 + $0x1e0] ss:$16 sps:$4 sm:$0xff]  }
 0x126   : > { %1551 = vmatpush2.bf16.msra.mxu0 %v3422_v8  ;;  %v4260_v8 = vld [vmem:[#allocation8 + $0x1c4] ss:$16 sps:$4 sm:$0xff]  }
 0x127   : > { %1552 = vmatprep.subr.bf16.mxu0 %v3430_v9  ;;  %v4263_v9 = vld [vmem:[#allocation8 + $0x220] ss:$16 sps:$4 sm:$0xff]  }
 0x128   : > { %1590 = vmatpush2.bf16.msra.mxu1 %v3425_v10  ;;  %v4266_v10 = vld [vmem:[#allocation8 + $0x204] ss:$16 sps:$4 sm:$0xff]  }
 0x129   : > { %1591 = vmatprep.subr.bf16.mxu1 %v3433_v11  ;;  %v4269_v11 = vld [vmem:[#allocation8 + $0x1c0] ss:$16 sps:$4 sm:$0xff]  }
 0x12a   : > { %1553 = vmatpush2.bf16.msra.mxu0 %v3428_v12  ;;  %v4272_v12 = vld [vmem:[#allocation8 + $0x1a4] ss:$16 sps:$4 sm:$0xff]  }
 0x12b   : > { %1554 = vmatprep.subr.bf16.mxu0 %v3436_v14  ;;  %v4275_v14 = vld [vmem:[#allocation8 + $0x200] ss:$16 sps:$4 sm:$0xff]  }
 0x12c   : > { %1592 = vmatpush2.bf16.msra.mxu1 %v3431_v16  ;;  %v4278_v16 = vld [vmem:[#allocation8 + $0x3e4] ss:$16 sps:$4 sm:$0xff]  }
 0x12d   : > { %1593 = vmatprep.subr.bf16.mxu1 %v3439_v17  ;;  %v4281_v17 = vld [vmem:[#allocation8 + $0x1a0] ss:$16 sps:$4 sm:$0xff]  }
 0x12e   : > { %1555 = vmatpush2.bf16.msra.mxu0 %v3434_v18  ;;  %v4284_v18 = vld [vmem:[#allocation8 + $0x184] ss:$16 sps:$4 sm:$0xff]  }
 0x12f   : > { %1556 = vmatprep.subr.bf16.mxu0 %v3442_v7  ;;  %v4287_v7 = vld [vmem:[#allocation8 + $0x3e0] ss:$16 sps:$4 sm:$0xff]  }
 0x130   : > { %1594 = vmatpush2.bf16.msra.mxu1 %v3437_v19  ;;  %v4290_v19 = vld [vmem:[#allocation8 + $0x3c4] ss:$16 sps:$4 sm:$0xff]  }
 0x131   : > { %1595 = vmatprep.subr.bf16.mxu1 %v3445_v20  ;;  %v4293_v20 = vld [vmem:[#allocation8 + $0x180] ss:$16 sps:$4 sm:$0xff]  }
 0x132   : > { %1557 = vmatpush2.bf16.msra.mxu0 %v3440_v21  ;;  %v4296_v21 = vld [vmem:[#allocation8 + $0x164] ss:$16 sps:$4 sm:$0xff]  }
 0x133   : > { %1558 = vmatprep.subr.bf16.mxu0 %v3448_v22  ;;  %v4299_v22 = vld [vmem:[#allocation8 + $0x3c0] ss:$16 sps:$4 sm:$0xff]  }
 0x134   : > { %1596 = vmatpush2.bf16.msra.mxu1 %v3443_v24  ;;  %v4302_v24 = vld [vmem:[#allocation8 + $0x3a4] ss:$16 sps:$4 sm:$0xff]  }
 0x135   : > { %1597 = vmatprep.subr.bf16.mxu1 %v3451_v25  ;;  %v4305_v25 = vld [vmem:[#allocation8 + $0x160] ss:$16 sps:$4 sm:$0xff]  }
 0x136   : > { %1559 = vmatpush2.bf16.msra.mxu0 %v3446_v26  ;;  %v4308_v26 = vld [vmem:[#allocation8 + $0x144] ss:$16 sps:$4 sm:$0xff]  }
 0x137   : > { %1560 = vmatprep.subr.bf16.mxu0 %v3454_v27  ;;  %v4311_v27 = vld [vmem:[#allocation8 + $0x3a0] ss:$16 sps:$4 sm:$0xff]  }
 0x138   : > { %1598 = vmatpush2.bf16.msra.mxu1 %v3449_v28  ;;  %v4314_v28 = vld [vmem:[#allocation8 + $0x384] ss:$16 sps:$4 sm:$0xff]  }
 0x139   : > { %1599 = vmatprep.subr.bf16.mxu1 %v3457_v30  ;;  %4819 = vst [vmem:[#allocation17_spill] sm:$0xff] %v4314_v28  ;;  %v4317_v30 = vld [vmem:[#allocation8 + $0x140] ss:$16 sps:$4 sm:$0xff]  }
 0x13a   : > { %1561 = vmatpush2.bf16.msra.mxu0 %v3452_v32  ;;  %4820 = vst [vmem:[#allocation18_spill] sm:$0xff] %v4317_v30  ;;  %v4320_v32 = vld [vmem:[#allocation8 + $0x124] ss:$16 sps:$4 sm:$0xff]  }
 0x13b   : > { %2256 = vmatprep.subr.bf16.mxu0 %v4166_v33  ;;  %4821 = vst [vmem:[#allocation19_spill] sm:$0xff] %v4320_v32 }
 0x13c   : > { %1600 = vmatpush2.bf16.msra.mxu1 %v3455_v34  ;;  %v4323_v34 = vld [vmem:[#allocation8 + $0x380] ss:$16 sps:$4 sm:$0xff]  }
 0x13d   : > { %1563 = vmatmul.mubr.bf16.vlgmr.msra.gmra.mxu0 %v4138_v13  ;;  %1601 = vmatprep.subr.bf16.mxu1 %v3460_v35  ;;  %4822 = vst [vmem:[#allocation20_spill] sm:$0xff] %v4323_v34  ;;  %v4326_v35 = vld [vmem:[#allocation8 + $0x364] ss:$16 sps:$4 sm:$0xff]  }
 0x13e   : > { %2257 = vmatpush1.bf16.msra.mxu0 %v4168_v36  ;;  %2288 = vmatprep.mubr.bf16.mxu0 %v4141_v15  ;;  %4823 = vst [vmem:[#allocation21_spill] sm:$0xff] %v4326_v35 }
 0x13f   : > { %2258 = vmatprep.subr.bf16.mxu0 %v4171_v37 }
 0x140   : > { %1602 = vmatpush2.bf16.msra.mxu1 %v3458_v38  ;;  %v4329_v38 = vld [vmem:[#allocation8 + $0x120] ss:$16 sps:$4 sm:$0xff]  }
 0x141   : > { %1603 = vmatprep.subr.bf16.mxu1 %v3466_v39  ;;  %4824 = vst [vmem:[#allocation22_spill] sm:$0xff] %v4329_v38  ;;  %v4332_v39 = vld [vmem:[#allocation8 + $0x104] ss:$16 sps:$4 sm:$0xff]  }
 0x142   : > { %2259 = vmatpush1.bf16.msra.mxu0 %v4176_v40  ;;  %4825 = vst [vmem:[#allocation23_spill] sm:$0xff] %v4332_v39 }
 0x143   : > { %2260 = vmatprep.subr.bf16.mxu0 %v4179_v41 }
 0x144   : > { %1604 = vmatpush2.bf16.msra.mxu1 %v3464_v42  ;;  %v4335_v42 = vld [vmem:[#allocation8 + $0x360] ss:$16 sps:$4 sm:$0xff]  }
 0x145   : > { %2299 = vmatprep.subr.bf16.mxu1 %v4181_v43  ;;  %4826 = vst [vmem:[#allocation24_spill] sm:$0xff] %v4335_v42 }
 0x146   : > { %2261 = vmatpush1.bf16.msra.mxu0 %v4184_v44 }
 0x147   : > { %1606 = vmatmul.mubr.bf16.vlgmr.msra.gmra.mxu1 %v4151_v29  ;;  %2262 = vmatprep.subr.bf16.mxu0 %v4187_v45 }
 0x148   : > { %2300 = vmatpush1.bf16.msra.mxu1 %v4189_v47  ;;  %2331 = vmatprep.mubr.bf16.mxu1 %v4153_v31 }
 0x149   : > { %2301 = vmatprep.subr.bf16.mxu1 %v4192_v49 }
 0x14a   : > { %2263 = vmatpush1.bf16.msra.mxu0 %v4195_v50 }
 0x14b   : > { %2264 = vmatprep.subr.bf16.mxu0 %v4199_v51 }
 0x14c   : > { %2302 = vmatpush1.bf16.msra.mxu1 %v4203_v52 }
 0x14d   : > { %2303 = vmatprep.subr.bf16.mxu1 %v4206_v53 }
 0x14e   : > { %2265 = vmatpush1.bf16.msra.mxu0 %v4209_v54 }
 0x14f   : > { %2266 = vmatprep.subr.bf16.mxu0 %v4212_v55 }
 0x150   : > { %2304 = vmatpush1.bf16.msra.mxu1 %v4215_v56 }
 0x151   : > { %2305 = vmatprep.subr.bf16.mxu1 %v4218_v57 }
 0x152   : > { %2267 = vmatpush1.bf16.msra.mxu0 %v4221_v58 }
 0x153   : > { %2268 = vmatprep.subr.bf16.mxu0 %v4224_v59 }
 0x154   : > { %2306 = vmatpush1.bf16.msra.mxu1 %v4227_v60 }
 0x155   : > { %2307 = vmatprep.subr.bf16.mxu1 %v4230_v61 }
 0x156   : > { %2269 = vmatpush1.bf16.msra.mxu0 %v4233_v62 }
 0x157   : > { %2270 = vmatprep.subr.bf16.mxu0 %v4236_v63 }
 0x158   : > { %2308 = vmatpush1.bf16.msra.mxu1 %v4239_v0 }
 0x159   : > { %2309 = vmatprep.subr.bf16.mxu1 %v4242_v1 }
 0x15a   : > { %2271 = vmatpush1.bf16.msra.mxu0 %v4245_v2 }
 0x15b   : > { %2272 = vmatprep.subr.bf16.mxu0 %v4248_v3 }
 0x15c   : > { %2310 = vmatpush1.bf16.msra.mxu1 %v4251_v4 }
 0x15d   : > { %2311 = vmatprep.subr.bf16.mxu1 %v4254_v5 }
 0x15e   : > { %2273 = vmatpush2.bf16.msra.mxu0 %v4257_v6 }
 0x15f   : > { %2274 = vmatprep.subr.bf16.mxu0 %v4260_v8 }
 0x160   : > { %2312 = vmatpush1.bf16.msra.mxu1 %v4263_v9 }
 0x161   : > { %2313 = vmatprep.subr.bf16.mxu1 %v4266_v10 }
 0x162   : > { %2275 = vmatpush2.bf16.msra.mxu0 %v4269_v11 }
 0x163   : > { %2276 = vmatprep.subr.bf16.mxu0 %v4272_v12 }
 0x164   : > { %2314 = vmatpush1.bf16.msra.mxu1 %v4275_v14 }
 0x165   : > { %2315 = vmatprep.subr.bf16.mxu1 %v4278_v16 }
 0x166   : > { %2277 = vmatpush2.bf16.msra.mxu0 %v4281_v17 }
 0x167   : > { %2278 = vmatprep.subr.bf16.mxu0 %v4284_v18 }
 0x168   : > { %2316 = vmatpush2.bf16.msra.mxu1 %v4287_v7 }
 0x169   : > { %2317 = vmatprep.subr.bf16.mxu1 %v4290_v19 }
 0x16a   : > { %2279 = vmatpush2.bf16.msra.mxu0 %v4293_v20 }
 0x16b   : > { %2280 = vmatprep.subr.bf16.mxu0 %v4296_v21 }
 0x16c   : > { %2318 = vmatpush2.bf16.msra.mxu1 %v4299_v22 }
 0x16d   : > { %2319 = vmatprep.subr.bf16.mxu1 %v4302_v24 }
 0x16e   : > { %2281 = vmatpush2.bf16.msra.mxu0 %v4305_v25 }
 0x16f   : > { %2282 = vmatprep.subr.bf16.mxu0 %v4308_v26 }
 0x170   : > { %2320 = vmatpush2.bf16.msra.mxu1 %v4311_v27 }
 0x171   : > { %2321 = vmatprep.subr.bf16.mxu1 %v4314_v28  ;;  %v4341_v28 = vld [vmem:[#allocation8 + $0x100] ss:$16 sps:$4 sm:$0xff]  }
 0x172   : > { %2283 = vmatpush2.bf16.msra.mxu0 %v4317_v30  ;;  %4828 = vst [vmem:[#allocation26_spill] sm:$0xff] %v4341_v28  ;;  %v4344_v30 = vld [vmem:[#allocation8 + $0xec] ss:$16 sps:$4 sm:$0xff]  }
 0x173   : > { %2284 = vmatprep.subr.bf16.mxu0 %v4320_v32  ;;  %4829 = vst [vmem:[#allocation27_spill] sm:$0xff] %v4344_v30  ;;  %v4347_v32 = vld [vmem:[#allocation8 + $0x340] ss:$16 sps:$4 sm:$0xff]  }
 0x174   : > { %2322 = vmatpush2.bf16.msra.mxu1 %v4323_v34  ;;  %4830 = vst [vmem:[#allocation28_spill] sm:$0xff] %v4347_v32  ;;  %v4350_v34 = vld [vmem:[#allocation8 + $0x324] ss:$16 sps:$4 sm:$0xff]  }
 0x175   : > { %2323 = vmatprep.subr.bf16.mxu1 %v4326_v35  ;;  %4831 = vst [vmem:[#allocation29_spill] sm:$0xff] %v4350_v34  ;;  %v4353_v35 = vld [vmem:[#allocation8 + $0xe8] ss:$16 sps:$4 sm:$0xff]  }
 0x176   : > { %2285 = vmatpush2.bf16.msra.mxu0 %v4329_v38  ;;  %v4356_v38 = vld [vmem:[#allocation8 + $0xcc] ss:$16 sps:$4 sm:$0xff]  }
 0x177   : > { %2286 = vmatprep.subr.bf16.mxu0 %v4332_v39  ;;  %4832 = vst [vmem:[#allocation30_spill] sm:$0xff] %v4356_v38  ;;  %v4359_v39 = vld [vmem:[#allocation8 + $0x320] ss:$16 sps:$4 sm:$0xff]  }
 0x178   : > { %2324 = vmatpush2.bf16.msra.mxu1 %v4335_v42  ;;  %4833 = vst [vmem:[#allocation31_spill] sm:$0xff] %v4359_v39  ;;  %v4363_v42 = vld [vmem:[#allocation8 + $0x304] ss:$16 sps:$4 sm:$0xff]  }
 0x179   : > { %2325 = vmatprep.subr.bf16.mxu1 %v4338_v46  ;;  %4834 = vst [vmem:[#allocation32_spill] sm:$0xff] %v4363_v42  ;;  %v4376_v46 = vld [vmem:[#allocation8 + $0x2ec] ss:$16 sps:$4 sm:$0xff]  }
 0x17a   : > { %2287 = vmatpush2.bf16.msra.mxu0 %v4341_v28  ;;  %v4367_v28 = vld [vmem:[#allocation8 + $0xc8] ss:$16 sps:$4 sm:$0xff]   ;;  %4838 = vst [vmem:[#allocation36_spill] sm:$0xff] %v4376_v46 }
 0x17b   : > { %2342 = vmatprep.subr.bf16.mxu0 %v4344_v30  ;;  %4835 = vst [vmem:[#allocation33_spill] sm:$0xff] %v4367_v28  ;;  %v4370_v30 = vld [vmem:[#allocation8 + $0xac] ss:$16 sps:$4 sm:$0xff]  }
 0x17c   : > { %2326 = vmatpush2.bf16.msra.mxu1 %v4347_v32  ;;  %4836 = vst [vmem:[#allocation34_spill] sm:$0xff] %v4370_v30  ;;  %v4373_v32 = vld [vmem:[#allocation8 + $0x300] ss:$16 sps:$4 sm:$0xff]  }
 0x17d   : > { %2289 = vmatmul.mubr.bf16.vlgmr.msra.gmra.mxu0 %v4138_v13  ;;  %2327 = vmatprep.subr.bf16.mxu1 %v4350_v34  ;;  %4837 = vst [vmem:[#allocation35_spill] sm:$0xff] %v4373_v32  ;;  %v4379_v34 = vld [vmem:[#allocation8 + $0xa8] ss:$16 sps:$4 sm:$0xff]  }
 0x17e   : > { %2343 = vmatpush1.bf16.msra.mxu0 %v4353_v35  ;;  %2374 = vmatprep.mubr.bf16.mxu0 %v4141_v15  ;;  %4839 = vst [vmem:[#allocation37_spill] sm:$0xff] %v4379_v34  ;;  %v4382_v15 = vld [vmem:[#allocation8 + $0x8c] ss:$16 sps:$4 sm:$0xff]  }
 0x17f   : > { %2344 = vmatprep.subr.bf16.mxu0 %v4356_v38  ;;  %4840 = vst [vmem:[#allocation38_spill] sm:$0xff] %v4382_v15  ;;  %v4385_v38 = vld [vmem:[#allocation8 + $0x2e8] ss:$16 sps:$4 sm:$0xff]  }
 0x180   : > { %2328 = vmatpush2.bf16.msra.mxu1 %v4359_v39  ;;  %v4388_v39 = vld [vmem:[#allocation8 + $0x2cc] ss:$16 sps:$4 sm:$0xff]  }
 0x181   : > { %2329 = vmatprep.subr.bf16.mxu1 %v4363_v42  ;;  %4841 = vst [vmem:[#allocation39_spill] sm:$0xff] %v4388_v39  ;;  %v4391_v42 = vld [vmem:[#allocation8 + $0x88] ss:$16 sps:$4 sm:$0xff]  }
 0x182   : > { %2345 = vmatpush1.bf16.msra.mxu0 %v4367_v28  ;;  %4842 = vst [vmem:[#allocation40_spill] sm:$0xff] %v4391_v42  ;;  %v4395_v28 = vld [vmem:[#allocation8 + $0x6c] ss:$16 sps:$4 sm:$0xff]  }
 0x183   : > { %2346 = vmatprep.subr.bf16.mxu0 %v4370_v30  ;;  %4843 = vst [vmem:[#allocation41_spill] sm:$0xff] %v4395_v28  ;;  %v4408_v30 = vld [vmem:[#allocation8 + $0x4c] ss:$16 sps:$4 sm:$0xff]  }
 0x184   : > { %2330 = vmatpush2.bf16.msra.mxu1 %v4373_v32  ;;  %v4399_v32 = vld [vmem:[#allocation8 + $0x2c8] ss:$16 sps:$4 sm:$0xff]   ;;  %4847 = vst [vmem:[#allocation45_spill] sm:$0xff] %v4408_v30 }
 0x185   : > { %2385 = vmatprep.subr.bf16.mxu1 %v4376_v46  ;;  %4844 = vst [vmem:[#allocation42_spill] sm:$0xff] %v4399_v32  ;;  %v4402_v46 = vld [vmem:[#allocation8 + $0x2ac] ss:$16 sps:$4 sm:$0xff]  }
 0x186   : > { %2347 = vmatpush1.bf16.msra.mxu0 %v4379_v34  ;;  %4845 = vst [vmem:[#allocation43_spill] sm:$0xff] %v4402_v46  ;;  %v4405_v34 = vld [vmem:[#allocation8 + $0x68] ss:$16 sps:$4 sm:$0xff]  }
 0x187   : > { %2332 = vmatmul.mubr.bf16.vlgmr.msra.gmra.mxu1 %v4151_v29  ;;  %2348 = vmatprep.subr.bf16.mxu0 %v4382_v15  ;;  %4846 = vst [vmem:[#allocation44_spill] sm:$0xff] %v4405_v34  ;;  %v4411_v15 = vld [vmem:[#allocation8 + $0x2a8] ss:$16 sps:$4 sm:$0xff]  }
 0x188   : > { %2386 = vmatpush1.bf16.msra.mxu1 %v4385_v38  ;;  %2417 = vmatprep.mubr.bf16.mxu1 %v4153_v31  ;;  %4848 = vst [vmem:[#allocation46_spill] sm:$0xff] %v4411_v15  ;;  %v4414_v31 = vld [vmem:[#allocation8 + $0x28c] ss:$16 sps:$4 sm:$0xff]  }
 0x189   : > { %2387 = vmatprep.subr.bf16.mxu1 %v4388_v39  ;;  %4849 = vst [vmem:[#allocation47_spill] sm:$0xff] %v4414_v31  ;;  %v4417_v39 = vld [vmem:[#allocation8 + $0x48] ss:$16 sps:$4 sm:$0xff]  }
 0x18a   : > { %2349 = vmatpush1.bf16.msra.mxu0 %v4391_v42  ;;  %4850 = vst [vmem:[#allocation48_spill] sm:$0xff] %v4417_v39  ;;  %v4420_v42 = vld [vmem:[#allocation8 + $0x2c] ss:$16 sps:$4 sm:$0xff]  }
 0x18b   : > { %2350 = vmatprep.subr.bf16.mxu0 %v4395_v28  ;;  %4851 = vst [vmem:[#allocation49_spill] sm:$0xff] %v4420_v42  ;;  %v4423_v28 = vld [vmem:[#allocation8 + $0x288] ss:$16 sps:$4 sm:$0xff]  }
 0x18c   : > { %2388 = vmatpush1.bf16.msra.mxu1 %v4399_v32  ;;  %4852 = vst [vmem:[#allocation50_spill] sm:$0xff] %v4423_v28  ;;  %v4426_v32 = vld [vmem:[#allocation8 + $0x26c] ss:$16 sps:$4 sm:$0xff]  }
 0x18d   : > { %2389 = vmatprep.subr.bf16.mxu1 %v4402_v46  ;;  %4853 = vst [vmem:[#allocation51_spill] sm:$0xff] %v4426_v32  ;;  %v4429_v46 = vld [vmem:[#allocation8 + $0x28] ss:$16 sps:$4 sm:$0xff]  }
 0x18e   : > { %2351 = vmatpush1.bf16.msra.mxu0 %v4405_v34  ;;  %4854 = vst [vmem:[#allocation52_spill] sm:$0xff] %v4429_v46  ;;  %v4432_v34 = vld [vmem:[#allocation8 + $0xc] ss:$16 sps:$4 sm:$0xff]  }
 0x18f   : > { %2352 = vmatprep.subr.bf16.mxu0 %v4408_v30  ;;  %4855 = vst [vmem:[#allocation53_spill] sm:$0xff] %v4432_v34  ;;  %v4435_v30 = vld [vmem:[#allocation8 + $0x268] ss:$16 sps:$4 sm:$0xff]  }
 0x190   : > { %2390 = vmatpush1.bf16.msra.mxu1 %v4411_v15  ;;  %4856 = vst [vmem:[#allocation54_spill] sm:$0xff] %v4435_v30  ;;  %v4438_v15 = vld [vmem:[#allocation8 + $0x24c] ss:$16 sps:$4 sm:$0xff]  }
 0x191   : > { %2391 = vmatprep.subr.bf16.mxu1 %v4414_v31  ;;  %4857 = vst [vmem:[#allocation55_spill] sm:$0xff] %v4438_v15  ;;  %v4441_v31 = vld [vmem:[#allocation8 + $0x8] ss:$16 sps:$4 sm:$0xff]  }
 0x192   : > { %2353 = vmatpush1.bf16.msra.mxu0 %v4417_v39  ;;  %4858 = vst [vmem:[#allocation56_spill] sm:$0xff] %v4441_v31  ;;  %v4444_v39 = vld [vmem:[#allocation8 + $0x1ec] ss:$16 sps:$4 sm:$0xff]  }
 0x193   : > { %2354 = vmatprep.subr.bf16.mxu0 %v4420_v42  ;;  %4859 = vst [vmem:[#allocation57_spill] sm:$0xff] %v4444_v39  ;;  %v4447_v42 = vld [vmem:[#allocation8 + $0x248] ss:$16 sps:$4 sm:$0xff]  }
 0x194   : > { %2392 = vmatpush1.bf16.msra.mxu1 %v4423_v28  ;;  %4860 = vst [vmem:[#allocation58_spill] sm:$0xff] %v4447_v42  ;;  %v4450_v28 = vld [vmem:[#allocation8 + $0x22c] ss:$16 sps:$4 sm:$0xff]  }
 0x195   : > { %2393 = vmatprep.subr.bf16.mxu1 %v4426_v32  ;;  %4861 = vst [vmem:[#allocation59_spill] sm:$0xff] %v4450_v28  ;;  %v4453_v32 = vld [vmem:[#allocation8 + $0x1e8] ss:$16 sps:$4 sm:$0xff]  }
 0x196   : > { %2355 = vmatpush1.bf16.msra.mxu0 %v4429_v46  ;;  %4862 = vst [vmem:[#allocation60_spill] sm:$0xff] %v4453_v32  ;;  %v4456_v46 = vld [vmem:[#allocation8 + $0x1cc] ss:$16 sps:$4 sm:$0xff]  }
 0x197   : > { %2356 = vmatprep.subr.bf16.mxu0 %v4432_v34  ;;  %4863 = vst [vmem:[#allocation61_spill] sm:$0xff] %v4456_v46  ;;  %v4459_v34 = vld [vmem:[#allocation8 + $0x228] ss:$16 sps:$4 sm:$0xff]  }
 0x198   : > { %2394 = vmatpush1.bf16.msra.mxu1 %v4435_v30  ;;  %4864 = vst [vmem:[#allocation62_spill] sm:$0xff] %v4459_v34  ;;  %v4462_v30 = vld [vmem:[#allocation8 + $0x20c] ss:$16 sps:$4 sm:$0xff]  }
 0x199   : > { %2395 = vmatprep.subr.bf16.mxu1 %v4438_v15  ;;  %4865 = vst [vmem:[#allocation63_spill] sm:$0xff] %v4462_v30  ;;  %v4465_v15 = vld [vmem:[#allocation8 + $0x1c8] ss:$16 sps:$4 sm:$0xff]  }
 0x19a   : > { %2357 = vmatpush1.bf16.msra.mxu0 %v4441_v31  ;;  %4866 = vst [vmem:[#allocation64_spill] sm:$0xff] %v4465_v15  ;;  %v4468_v31 = vld [vmem:[#allocation8 + $0x1ac] ss:$16 sps:$4 sm:$0xff]  }
 0x19b   : > { %2358 = vmatprep.subr.bf16.mxu0 %v4444_v39  ;;  %4867 = vst [vmem:[#allocation65_spill] sm:$0xff] %v4468_v31  ;;  %v4471_v39 = vld [vmem:[#allocation8 + $0x208] ss:$16 sps:$4 sm:$0xff]  }
 0x19c   : > { %2396 = vmatpush1.bf16.msra.mxu1 %v4447_v42  ;;  %4868 = vst [vmem:[#allocation66_spill] sm:$0xff] %v4471_v39  ;;  %v4474_v42 = vld [vmem:[#allocation8 + $0x3ec] ss:$16 sps:$4 sm:$0xff]  }
 0x19d   : > { %2397 = vmatprep.subr.bf16.mxu1 %v4450_v28  ;;  %4869 = vst [vmem:[#allocation67_spill] sm:$0xff] %v4474_v42  ;;  %v4477_v28 = vld [vmem:[#allocation8 + $0x1a8] ss:$16 sps:$4 sm:$0xff]  }
 0x19e   : > { %2359 = vmatpush2.bf16.msra.mxu0 %v4453_v32  ;;  %4870 = vst [vmem:[#allocation68_spill] sm:$0xff] %v4477_v28  ;;  %v4480_v32 = vld [vmem:[#allocation8 + $0x18c] ss:$16 sps:$4 sm:$0xff]  }
 0x19f   : > { %2360 = vmatprep.subr.bf16.mxu0 %v4456_v46  ;;  %4871 = vst [vmem:[#allocation69_spill] sm:$0xff] %v4480_v32  ;;  %v4483_v46 = vld [vmem:[#allocation8 + $0x3e8] ss:$16 sps:$4 sm:$0xff]  }
 0x1a0   : > { %2398 = vmatpush1.bf16.msra.mxu1 %v4459_v34  ;;  %4872 = vst [vmem:[#allocation70_spill] sm:$0xff] %v4483_v46  ;;  %v4486_v34 = vld [vmem:[#allocation8 + $0x3cc] ss:$16 sps:$4 sm:$0xff]  }
 0x1a1   : > { %2399 = vmatprep.subr.bf16.mxu1 %v4462_v30  ;;  %4873 = vst [vmem:[#allocation71_spill] sm:$0xff] %v4486_v34  ;;  %v4489_v30 = vld [vmem:[#allocation8 + $0x188] ss:$16 sps:$4 sm:$0xff]  }
 0x1a2   : > { %2361 = vmatpush2.bf16.msra.mxu0 %v4465_v15  ;;  %4874 = vst [vmem:[#allocation72_spill] sm:$0xff] %v4489_v30  ;;  %v4492_v15 = vld [vmem:[#allocation8 + $0x16c] ss:$16 sps:$4 sm:$0xff]  }
 0x1a3   : > { %2362 = vmatprep.subr.bf16.mxu0 %v4468_v31  ;;  %4875 = vst [vmem:[#allocation73_spill] sm:$0xff] %v4492_v15  ;;  %v4495_v31 = vld [vmem:[#allocation8 + $0x3c8] ss:$16 sps:$4 sm:$0xff]  }
 0x1a4   : > { %2400 = vmatpush1.bf16.msra.mxu1 %v4471_v39  ;;  %4876 = vst [vmem:[#allocation74_spill] sm:$0xff] %v4495_v31  ;;  %v4498_v39 = vld [vmem:[#allocation8 + $0x3ac] ss:$16 sps:$4 sm:$0xff]  }
 0x1a5   : > { %2401 = vmatprep.subr.bf16.mxu1 %v4474_v42  ;;  %4877 = vst [vmem:[#allocation75_spill] sm:$0xff] %v4498_v39  ;;  %v4501_v42 = vld [vmem:[#allocation8 + $0x168] ss:$16 sps:$4 sm:$0xff]  }
 0x1a6   : > { %2363 = vmatpush2.bf16.msra.mxu0 %v4477_v28  ;;  %4878 = vst [vmem:[#allocation76_spill] sm:$0xff] %v4501_v42  ;;  %v4504_v28 = vld [vmem:[#allocation8 + $0x14c] ss:$16 sps:$4 sm:$0xff]  }
 0x1a7   : > { %2364 = vmatprep.subr.bf16.mxu0 %v4480_v32  ;;  %4879 = vst [vmem:[#allocation77_spill] sm:$0xff] %v4504_v28  ;;  %v4507_v32 = vld [vmem:[#allocation8 + $0x3a8] ss:$16 sps:$4 sm:$0xff]  }
 0x1a8   : > { %2402 = vmatpush2.bf16.msra.mxu1 %v4483_v46  ;;  %4880 = vst [vmem:[#allocation78_spill] sm:$0xff] %v4507_v32  ;;  %v4510_v46 = vld [vmem:[#allocation8 + $0x38c] ss:$16 sps:$4 sm:$0xff]  }
 0x1a9   : > { %2403 = vmatprep.subr.bf16.mxu1 %v4486_v34  ;;  %4881 = vst [vmem:[#allocation79_spill] sm:$0xff] %v4510_v46  ;;  %v4513_v34 = vld [vmem:[#allocation8 + $0x148] ss:$16 sps:$4 sm:$0xff]  }
 0x1aa   : > { %2365 = vmatpush2.bf16.msra.mxu0 %v4489_v30  ;;  %4882 = vst [vmem:[#allocation80_spill] sm:$0xff] %v4513_v34  ;;  %v4516_v30 = vld [vmem:[#allocation8 + $0x12c] ss:$16 sps:$4 sm:$0xff]  }
 0x1ab   : > { %2366 = vmatprep.subr.bf16.mxu0 %v4492_v15  ;;  %4883 = vst [vmem:[#allocation81_spill] sm:$0xff] %v4516_v30  ;;  %v4519_v15 = vld [vmem:[#allocation8 + $0x388] ss:$16 sps:$4 sm:$0xff]  }
 0x1ac   : > { %2404 = vmatpush2.bf16.msra.mxu1 %v4495_v31  ;;  %v4522_v31 = vld [vmem:[#allocation8 + $0x36c] ss:$16 sps:$4 sm:$0xff]  }
 0x1ad   : > { %2405 = vmatprep.subr.bf16.mxu1 %v4498_v39  ;;  %4884 = vst [vmem:[#allocation82_spill] sm:$0xff] %v4522_v31  ;;  %v4525_v39 = vld [vmem:[#allocation8 + $0x128] ss:$16 sps:$4 sm:$0xff]  }
 0x1ae   : > { %2367 = vmatpush2.bf16.msra.mxu0 %v4501_v42  ;;  %v4528_v42 = vld [vmem:[#allocation8 + $0x10c] ss:$16 sps:$4 sm:$0xff]  }
 0x1af   : > { %2368 = vmatprep.subr.bf16.mxu0 %v4504_v28  ;;  %4885 = vst [vmem:[#allocation83_spill] sm:$0xff] %v4528_v42  ;;  %v4531_v28 = vld [vmem:[#allocation8 + $0x368] ss:$16 sps:$4 sm:$0xff]  }
 0x1b0   : > { %2406 = vmatpush2.bf16.msra.mxu1 %v4507_v32  ;;  %v4534_v32 = vld [vmem:[#allocation8 + $0x34c] ss:$16 sps:$4 sm:$0xff]  }
 0x1b1   : > { %2407 = vmatprep.subr.bf16.mxu1 %v4510_v46  ;;  %v4537_v46 = vld [vmem:[#allocation8 + $0x108] ss:$16 sps:$4 sm:$0xff]  }
 0x1b2   : > { %2369 = vmatpush2.bf16.msra.mxu0 %v4513_v34  ;;  %4886 = vst [vmem:[#allocation84_spill] sm:$0xff] %v4537_v46  ;;  %v4541_v34 = vld [vmem:[#allocation8 + $0x348] ss:$16 sps:$4 sm:$0xff]  }
 0x1b3   : > { %2370 = vmatprep.subr.bf16.mxu0 %v4516_v30  ;;  %v4544_v30 = vld [vmem:[#allocation8 + $0x32c] ss:$16 sps:$4 sm:$0xff]  }
 0x1b4   : > { %2408 = vmatpush2.bf16.msra.mxu1 %v4519_v15 }
 0x1b5   : > { %2409 = vmatprep.subr.bf16.mxu1 %v4522_v31  ;;  %v4549_v31 = vld [vmem:[#allocation8 + $0x328] ss:$16 sps:$4 sm:$0xff]  }
 0x1b6   : > { %2371 = vmatpush2.bf16.msra.mxu0 %v4525_v39 }
 0x1b7   : > { %2372 = vmatprep.subr.bf16.mxu0 %v4528_v42  ;;  %v4553_v42 = vld [vmem:[#allocation8 + $0x30c] ss:$16 sps:$4 sm:$0xff]  }
 0x1b8   : > { %2410 = vmatpush2.bf16.msra.mxu1 %v4531_v28 }
 0x1b9   : > { %2411 = vmatprep.subr.bf16.mxu1 %v4534_v32 }
 0x1ba   : > { %2373 = vmatpush2.bf16.msra.mxu0 %v4537_v46  ;;  %v4559_v46 = vld [vmem:[#allocation8 + $0x308] ss:$16 sps:$4 sm:$0xff]  }
 0x1bb   : > { %2428 = vmatprep.subr.bf16.mxu0 %v4166_v33  ;;  %v528_v33 = vunpack.c.l.bf16 %v4138_v13 }
 0x1bc   : > { %2412 = vmatpush2.bf16.msra.mxu1 %v4541_v34 }
 0x1bd   : > { %2375 = vmatmul.mubr.bf16.vlgmr.msra.gmra.mxu0 %v4138_v13  ;;  %2413 = vmatprep.subr.bf16.mxu1 %v4544_v30 }
 0x1be   : > { %2429 = vmatpush1.bf16.msra.mxu0 %v4168_v36  ;;  %2460 = vmatprep.mubr.bf16.mxu0 %v4149_v23  ;;  %v532_v36 = vunpack.c.h.bf16 %v4138_v13 }
 0x1bf   : > { %2430 = vmatprep.subr.bf16.mxu0 %v4171_v37  ;;  %v4888_v37 = vld [vmem:[#allocation18_spill] sm:$0xff] }
 0x1c0   : > { %2414 = vmatpush2.bf16.msra.mxu1 %v4549_v31 }
 0x1c1   : > { %2415 = vmatprep.subr.bf16.mxu1 %v4553_v42 }
 0x1c2   : > { %2431 = vmatpush1.bf16.msra.mxu0 %v4176_v40  ;;  %v4889_v40 = vld [vmem:[#allocation19_spill] sm:$0xff] }
 0x1c3   : > { %2432 = vmatprep.subr.bf16.mxu0 %v4179_v41  ;;  %v4890_v41 = vld [vmem:[#allocation20_spill] sm:$0xff] }
 0x1c4   : > { %2416 = vmatpush2.bf16.msra.mxu1 %v4559_v46 }
 0x1c5   : > { %2471 = vmatprep.subr.bf16.mxu1 %v4181_v43  ;;  %v4891_v43 = vld [vmem:[#allocation21_spill] sm:$0xff] }
 0x1c6   : > { %2433 = vmatpush1.bf16.msra.mxu0 %v4184_v44  ;;  %v3674_v44 = vld [vmem:[#allocation3] sm:$0xff] }
 0x1c7   : > { %2418 = vmatmul.mubr.bf16.vlgmr.msra.gmra.mxu1 %v4151_v29  ;;  %2434 = vmatprep.subr.bf16.mxu0 %v4187_v45  ;;  %v4887_v29 = vld [vmem:[#allocation17_spill] sm:$0xff]  ;;  %v536_v45 = vsub.f32 %v3674_v44, %v528_v33  ;;  %v4942_v44 = vld [vmem:[#allocation71_spill] sm:$0xff] }
 0x1c8   : > { %2472 = vmatpush1.bf16.msra.mxu1 %v4189_v47  ;;  %2503 = vmatprep.mubr.bf16.mxu1 %v4164_v48  ;;  %v3675_v47 = vld [vmem:[#allocation2] sm:$0xff]  ;;  %v4936_v33 = vld [vmem:[#allocation65_spill] sm:$0xff] }
 0x1c9   : > { %2473 = vmatprep.subr.bf16.mxu1 %v4192_v49  ;;  %v540_v49 = vsub.f32 %v3675_v47, %v532_v36  ;;  %v4937_v36 = vld [vmem:[#allocation66_spill] sm:$0xff]  ;;  %v4944_v47 = vld [vmem:[#allocation73_spill] sm:$0xff] }
 0x1ca   : > { %2435 = vmatpush1.bf16.msra.mxu0 %v4195_v50  ;;  %v4892_v50 = vld [vmem:[#allocation22_spill] sm:$0xff] }
 0x1cb   : > { %2436 = vmatprep.subr.bf16.mxu0 %v4199_v51  ;;  %v4893_v51 = vld [vmem:[#allocation23_spill] sm:$0xff]  ;;  %v4622_v13 = vpack.c.bf16 %v540_v49, %v536_v45  ;;  %v4943_v45 = vld [vmem:[#allocation72_spill] sm:$0xff]  ;;  %v4945_v49 = vld [vmem:[#allocation74_spill] sm:$0xff] }
 0x1cc   : > { %2474 = vmatpush1.bf16.msra.mxu1 %v4203_v52  ;;  %v4894_v52 = vld [vmem:[#allocation24_spill] sm:$0xff] }
 0x1cd   : > { %2475 = vmatprep.subr.bf16.mxu1 %v4206_v53  ;;  %v4895_v53 = vld [vmem:[#allocation25_spill] sm:$0xff] }
 0x1ce   : > { %2437 = vmatpush1.bf16.msra.mxu0 %v4209_v54  ;;  %v4896_v54 = vld [vmem:[#allocation26_spill] sm:$0xff] }
 0x1cf   : > { %2438 = vmatprep.subr.bf16.mxu0 %v4212_v55  ;;  %v4897_v55 = vld [vmem:[#allocation27_spill] sm:$0xff] }
 0x1d0   : > { %2476 = vmatpush1.bf16.msra.mxu1 %v4215_v56  ;;  %v4898_v56 = vld [vmem:[#allocation28_spill] sm:$0xff] }
 0x1d1   : > { %2477 = vmatprep.subr.bf16.mxu1 %v4218_v57  ;;  %v4899_v57 = vld [vmem:[#allocation29_spill] sm:$0xff] }
 0x1d2   : > { %2439 = vmatpush1.bf16.msra.mxu0 %v4221_v58  ;;  %v4900_v58 = vld [vmem:[#allocation30_spill] sm:$0xff] }
 0x1d3   : > { %2440 = vmatprep.subr.bf16.mxu0 %v4224_v59  ;;  %v4901_v59 = vld [vmem:[#allocation31_spill] sm:$0xff] }
 0x1d4   : > { %2478 = vmatpush1.bf16.msra.mxu1 %v4227_v60  ;;  %v4902_v60 = vld [vmem:[#allocation32_spill] sm:$0xff] }
 0x1d5   : > { %2479 = vmatprep.subr.bf16.mxu1 %v4230_v61  ;;  %v4903_v61 = vld [vmem:[#allocation33_spill] sm:$0xff] }
 0x1d6   : > { %2441 = vmatpush1.bf16.msra.mxu0 %v4233_v62  ;;  %v4904_v62 = vld [vmem:[#allocation34_spill] sm:$0xff] }
 0x1d7   : > { %2442 = vmatprep.subr.bf16.mxu0 %v4236_v63  ;;  %v4905_v63 = vld [vmem:[#allocation35_spill] sm:$0xff] }
 0x1d8   : > { %2480 = vmatpush1.bf16.msra.mxu1 %v4239_v0  ;;  %v4906_v0 = vld [vmem:[#allocation36_spill] sm:$0xff] }
 0x1d9   : > { %2481 = vmatprep.subr.bf16.mxu1 %v4242_v1  ;;  %v4907_v1 = vld [vmem:[#allocation37_spill] sm:$0xff] }
 0x1da   : > { %2443 = vmatpush1.bf16.msra.mxu0 %v4245_v2  ;;  %v4908_v2 = vld [vmem:[#allocation16_spill] sm:$0xff] }
 0x1db   : > { %2444 = vmatprep.subr.bf16.mxu0 %v4248_v3  ;;  %v4910_v3 = vld [vmem:[#allocation39_spill] sm:$0xff] }
 0x1dc   : > { %2482 = vmatpush1.bf16.msra.mxu1 %v4251_v4  ;;  %v4911_v4 = vld [vmem:[#allocation40_spill] sm:$0xff] }
 0x1dd   : > { %2483 = vmatprep.subr.bf16.mxu1 %v4254_v5  ;;  %v4912_v5 = vld [vmem:[#allocation41_spill] sm:$0xff] }
 0x1de   : > { %2445 = vmatpush2.bf16.msra.mxu0 %v4257_v6  ;;  %v4913_v6 = vld [vmem:[#allocation42_spill] sm:$0xff] }
 0x1df   : > { %2446 = vmatprep.subr.bf16.mxu0 %v4260_v8  ;;  %v4914_v8 = vld [vmem:[#allocation43_spill] sm:$0xff] }
 0x1e0   : > { %2484 = vmatpush1.bf16.msra.mxu1 %v4263_v9  ;;  %v4915_v9 = vld [vmem:[#allocation44_spill] sm:$0xff] }
 0x1e1   : > { %2485 = vmatprep.subr.bf16.mxu1 %v4266_v10  ;;  %v4916_v10 = vld [vmem:[#allocation45_spill] sm:$0xff] }
 0x1e2   : > { %2447 = vmatpush2.bf16.msra.mxu0 %v4269_v11  ;;  %v4917_v11 = vld [vmem:[#allocation46_spill] sm:$0xff] }
 0x1e3   : > { %2448 = vmatprep.subr.bf16.mxu0 %v4272_v12  ;;  %v4918_v12 = vld [vmem:[#allocation47_spill] sm:$0xff] }
 0x1e4   : > { %2486 = vmatpush1.bf16.msra.mxu1 %v4275_v14  ;;  %v4919_v14 = vld [vmem:[#allocation48_spill] sm:$0xff] }
 0x1e5   : > { %2487 = vmatprep.subr.bf16.mxu1 %v4278_v16  ;;  %v4921_v16 = vld [vmem:[#allocation50_spill] sm:$0xff] }
 0x1e6   : > { %2449 = vmatpush2.bf16.msra.mxu0 %v4281_v17  ;;  %v4922_v17 = vld [vmem:[#allocation51_spill] sm:$0xff] }
 0x1e7   : > { %2450 = vmatprep.subr.bf16.mxu0 %v4284_v18  ;;  %v4923_v18 = vld [vmem:[#allocation52_spill] sm:$0xff] }
 0x1e8   : > { %2488 = vmatpush2.bf16.msra.mxu1 %v4287_v7  ;;  %v4924_v7 = vld [vmem:[#allocation53_spill] sm:$0xff] }
 0x1e9   : > { %2489 = vmatprep.subr.bf16.mxu1 %v4290_v19  ;;  %v4925_v19 = vld [vmem:[#allocation54_spill] sm:$0xff] }
 0x1ea   : > { %2451 = vmatpush2.bf16.msra.mxu0 %v4293_v20  ;;  %v4926_v20 = vld [vmem:[#allocation55_spill] sm:$0xff] }
 0x1eb   : > { %2452 = vmatprep.subr.bf16.mxu0 %v4296_v21  ;;  %v4927_v21 = vld [vmem:[#allocation56_spill] sm:$0xff] }
 0x1ec   : > { %2490 = vmatpush2.bf16.msra.mxu1 %v4299_v22  ;;  %v4928_v22 = vld [vmem:[#allocation57_spill] sm:$0xff] }
 0x1ed   : > { %2491 = vmatprep.subr.bf16.mxu1 %v4302_v24  ;;  %v4929_v24 = vld [vmem:[#allocation58_spill] sm:$0xff] }
 0x1ee   : > { %2453 = vmatpush2.bf16.msra.mxu0 %v4305_v25  ;;  %v4930_v25 = vld [vmem:[#allocation59_spill] sm:$0xff] }
 0x1ef   : > { %2454 = vmatprep.subr.bf16.mxu0 %v4308_v26  ;;  %v4931_v26 = vld [vmem:[#allocation60_spill] sm:$0xff] }
 0x1f0   : > { %2492 = vmatpush2.bf16.msra.mxu1 %v4311_v27  ;;  %v4932_v27 = vld [vmem:[#allocation61_spill] sm:$0xff] }
 0x1f1   : > { %2493 = vmatprep.subr.bf16.mxu1 %v4887_v29  ;;  %v4935_v29 = vld [vmem:[#allocation64_spill] sm:$0xff] }
 0x1f2   : > { %2455 = vmatpush2.bf16.msra.mxu0 %v4888_v37  ;;  %v4938_v37 = vld [vmem:[#allocation67_spill] sm:$0xff] }
 0x1f3   : > { %2456 = vmatprep.subr.bf16.mxu0 %v4889_v40  ;;  %v4939_v40 = vld [vmem:[#allocation68_spill] sm:$0xff] }
 0x1f4   : > { %2494 = vmatpush2.bf16.msra.mxu1 %v4890_v41  ;;  %v4940_v41 = vld [vmem:[#allocation69_spill] sm:$0xff] }
 0x1f5   : > { %2495 = vmatprep.subr.bf16.mxu1 %v4891_v43  ;;  %v4941_v43 = vld [vmem:[#allocation70_spill] sm:$0xff] }
 0x1f6   : > { %2457 = vmatpush2.bf16.msra.mxu0 %v4892_v50  ;;  %v4946_v50 = vld [vmem:[#allocation75_spill] sm:$0xff] }
 0x1f7   : > { %2458 = vmatprep.subr.bf16.mxu0 %v4893_v51  ;;  %v4947_v51 = vld [vmem:[#allocation76_spill] sm:$0xff] }
 0x1f8   : > { %2496 = vmatpush2.bf16.msra.mxu1 %v4894_v52  ;;  %v4948_v52 = vld [vmem:[#allocation77_spill] sm:$0xff] }
 0x1f9   : > { %2497 = vmatprep.subr.bf16.mxu1 %v4895_v53  ;;  %v4949_v53 = vld [vmem:[#allocation78_spill] sm:$0xff] }
 0x1fa   : > { %2459 = vmatpush2.bf16.msra.mxu0 %v4896_v54  ;;  %v4950_v54 = vld [vmem:[#allocation79_spill] sm:$0xff] }
 0x1fb   : > { %2514 = vmatprep.subr.bf16.mxu0 %v4897_v55  ;;  %v4951_v55 = vld [vmem:[#allocation80_spill] sm:$0xff] }
 0x1fc   : > { %2498 = vmatpush2.bf16.msra.mxu1 %v4898_v56  ;;  %v4952_v56 = vld [vmem:[#allocation81_spill] sm:$0xff] }
 0x1fd   : > { %2461 = vmatmul.mubr.bf16.vlgmr.msra.gmra.mxu0 %v4622_v13  ;;  %2499 = vmatprep.subr.bf16.mxu1 %v4899_v57  ;;  %v4953_v57 = vld [vmem:[#allocation82_spill] sm:$0xff] }
 0x1fe   : > { %2546 = vmatprep.mubr.bf16.mxu0 %v4149_v23  ;;  %2515 = vmatpush1.bf16.msra.mxu0 %v4353_v35  ;;  %v4909_v23 = vld [vmem:[#allocation38_spill] sm:$0xff] }
 0x1ff   : > { %2516 = vmatprep.subr.bf16.mxu0 %v4900_v58  ;;  %v4933_v35 = vld [vmem:[#allocation62_spill] sm:$0xff]  ;;  %v4954_v58 = vld [vmem:[#allocation83_spill] sm:$0xff] }
 0x200   : > { %2500 = vmatpush2.bf16.msra.mxu1 %v4901_v59  ;;  %v4955_v59 = vld [vmem:[#allocation84_spill] sm:$0xff] }
 0x201   : > { %2501 = vmatprep.subr.bf16.mxu1 %v4902_v60  ;;  %v1521_v60 = vpop.f32.mrf.mxu1 }
 0x202   : > { %2517 = vmatpush1.bf16.msra.mxu0 %v4903_v61 }
 0x203   : > { %2518 = vmatprep.subr.bf16.mxu0 %v4904_v62  ;;  %v1523_v61 = vpop.f32.mrf.mxu1 }
 0x204   : > { %2502 = vmatpush2.bf16.msra.mxu1 %v4905_v63 }
 0x205   : > { %2557 = vmatprep.subr.bf16.mxu1 %v4906_v0  ;;  %v1525_v62 = vpop.f32.mrf.mxu1 }
 0x206   : > { %2519 = vmatpush1.bf16.msra.mxu0 %v4907_v1 }
 0x207   : > { %2504 = vmatmul.mubr.bf16.vlgmr.msra.gmra.mxu1 %v4908_v2  ;;  %2520 = vmatprep.subr.bf16.mxu0 %v4909_v23  ;;  %v1527_v63 = vpop.f32.mrf.mxu1 }
 0x208   : > { %2558 = vmatpush1.bf16.msra.mxu1 %v4385_v38  ;;  %2589 = vmatprep.mubr.bf16.mxu1 %v4164_v48  ;;  %v4920_v48 = vld [vmem:[#allocation49_spill] sm:$0xff]  ;;  %v4934_v38 = vld [vmem:[#allocation63_spill] sm:$0xff] }
 0x209   : > { %2559 = vmatprep.subr.bf16.mxu1 %v4910_v3  ;;  %v1607_v0 = vpop.f32.mrf.mxu1 }
 0x20a   : > { %2521 = vmatpush1.bf16.msra.mxu0 %v4911_v4 }
 0x20b   : > { %2522 = vmatprep.subr.bf16.mxu0 %v4912_v5  ;;  %v1609_v1 = vpop.f32.mrf.mxu1 }
 0x20c   : > { %2560 = vmatpush1.bf16.msra.mxu1 %v4913_v6 }
 0x20d   : > { %2561 = vmatprep.subr.bf16.mxu1 %v4914_v8  ;;  %v1611_v23 = vpop.f32.mrf.mxu1 }
 0x20e   : > { %2523 = vmatpush1.bf16.msra.mxu0 %v4915_v9 }
 0x20f   : > { %2524 = vmatprep.subr.bf16.mxu0 %v4916_v10  ;;  %v1613_v3 = vpop.f32.mrf.mxu1 }
 0x210   : > { %2562 = vmatpush1.bf16.msra.mxu1 %v4917_v11 }
 0x211   : > { %2563 = vmatprep.subr.bf16.mxu1 %v4918_v12 }
 0x212   : > { %2525 = vmatpush1.bf16.msra.mxu0 %v4919_v14 }
 0x213   : > { %2526 = vmatprep.subr.bf16.mxu0 %v4920_v48 }
 0x214   : > { %2564 = vmatpush1.bf16.msra.mxu1 %v4921_v16 }
 0x215   : > { %2565 = vmatprep.subr.bf16.mxu1 %v4922_v17 }
 0x216   : > { %2527 = vmatpush1.bf16.msra.mxu0 %v4923_v18 }
 0x217   : > { %2528 = vmatprep.subr.bf16.mxu0 %v4924_v7 }
 0x218   : > { %2566 = vmatpush1.bf16.msra.mxu1 %v4925_v19 }
 0x219   : > { %2567 = vmatprep.subr.bf16.mxu1 %v4926_v20 }
 0x21a   : > { %2529 = vmatpush1.bf16.msra.mxu0 %v4927_v21 }
 0x21b   : > { %2530 = vmatprep.subr.bf16.mxu0 %v4928_v22 }
 0x21c   : > { %2568 = vmatpush1.bf16.msra.mxu1 %v4929_v24 }
 0x21d   : > { %2569 = vmatprep.subr.bf16.mxu1 %v4930_v25 }
 0x21e   : > { %2531 = vmatpush2.bf16.msra.mxu0 %v4931_v26 }
 0x21f   : > { %2532 = vmatprep.subr.bf16.mxu0 %v4932_v27 }
 0x220   : > { %2570 = vmatpush1.bf16.msra.mxu1 %v4933_v35 }
 0x221   : > { %2571 = vmatprep.subr.bf16.mxu1 %v4934_v38 }
 0x222   : > { %2533 = vmatpush2.bf16.msra.mxu0 %v4935_v29 }
 0x223   : > { %2534 = vmatprep.subr.bf16.mxu0 %v4936_v33 }
 0x224   : > { %2572 = vmatpush1.bf16.msra.mxu1 %v4937_v36 }
 0x225   : > { %2573 = vmatprep.subr.bf16.mxu1 %v4938_v37 }
 0x226   : > { %2535 = vmatpush2.bf16.msra.mxu0 %v4939_v40 }
 0x227   : > { %2536 = vmatprep.subr.bf16.mxu0 %v4940_v41 }
 0x228   : > { %2574 = vmatpush2.bf16.msra.mxu1 %v4941_v43 }
 0x229   : > { %2575 = vmatprep.subr.bf16.mxu1 %v4942_v44 }
 0x22a   : > { %2537 = vmatpush2.bf16.msra.mxu0 %v4943_v45 }
 0x22b   : > { %2538 = vmatprep.subr.bf16.mxu0 %v4944_v47 }
 0x22c   : > { %2576 = vmatpush2.bf16.msra.mxu1 %v4945_v49 }
 0x22d   : > { %2577 = vmatprep.subr.bf16.mxu1 %v4946_v50 }
 0x22e   : > { %2539 = vmatpush2.bf16.msra.mxu0 %v4947_v51 }
 0x22f   : > { %2540 = vmatprep.subr.bf16.mxu0 %v4948_v52 }
 0x230   : > { %2578 = vmatpush2.bf16.msra.mxu1 %v4949_v53 }
 0x231   : > { %2579 = vmatprep.subr.bf16.mxu1 %v4950_v54 }
 0x232   : > { %2541 = vmatpush2.bf16.msra.mxu0 %v4951_v55 }
 0x233   : > { %2542 = vmatprep.subr.bf16.mxu0 %v4952_v56 }
 0x234   : > { %2580 = vmatpush2.bf16.msra.mxu1 %v4519_v15 }
 0x235   : > { %2581 = vmatprep.subr.bf16.mxu1 %v4953_v57 }
 0x236   : > { %2543 = vmatpush2.bf16.msra.mxu0 %v4525_v39  ;;  %v3658_v39 = vld [vmem:[#allocation11 + $0x4] ss:$8 sps:$4 sm:$0xff]  }
 0x237   : > { %2544 = vmatprep.subr.bf16.mxu0 %v4954_v58 }
 0x238   : > { %2582 = vmatpush2.bf16.msra.mxu1 %v4531_v28  ;;  %v3661_v28 = vld [vmem:[#allocation11 + $0x14] ss:$8 sps:$4 sm:$0xff]  }
 0x239   : > { %2583 = vmatprep.subr.bf16.mxu1 %v4534_v32  ;;  %v1478_v32 = vpop.f32.mrf.mxu0 }
 0x23a   : > { %2545 = vmatpush2.bf16.msra.mxu0 %v4955_v59  ;;  %v1522_v29 = vadd.f32 %v1521_v60, %v1478_v32 }
 0x23b   : > { %v1480_v15 = vpop.f32.mrf.mxu0 }
 0x23c   : > { %2584 = vmatpush2.bf16.msra.mxu1 %v4541_v34  ;;  %v1524_v38 = vadd.f32 %v1523_v61, %v1480_v15 }
 0x23d   : > { %2585 = vmatprep.subr.bf16.mxu1 %v4544_v30  ;;  %2547 = vmatmul.mubr.bf16.vlgmr.msra.gmra.mxu0 %v4622_v13  ;;  %v1482_v34 = vpop.f32.mrf.mxu0 }
 0x23e   : > { %2686 = vmatprep.mubr.bf16.mxu0 %v3658_v39  ;;  %v1526_v37 = vadd.f32 %v1525_v62, %v1482_v34 }
 0x23f   : > { %v1484_v30 = vpop.f32.mrf.mxu0 }
 0x240   : > { %2586 = vmatpush2.bf16.msra.mxu1 %v4549_v31  ;;  %v1528_v40 = vadd.f32 %v1527_v63, %v1484_v30 }
 0x241   : > { %2587 = vmatprep.subr.bf16.mxu1 %v4553_v42  ;;  %v1564_v13 = vpop.f32.mrf.mxu0 }
 0x242   : > { %v1608_v44 = vadd.f32 %v1607_v0, %v1564_v13 }
 0x243   : > { %v1566_v31 = vpop.f32.mrf.mxu0 }
 0x244   : > { %2588 = vmatpush2.bf16.msra.mxu1 %v4559_v46  ;;  %v1610_v41 = vadd.f32 %v1609_v1, %v1566_v31 }
 0x245   : > { %v1568_v42 = vpop.f32.mrf.mxu0 }
 0x246   : > { %v1612_v45 = vadd.f32 %v1611_v23, %v1568_v42 }
 0x247   : > { %2590 = vmatmul.mubr.bf16.vlgmr.msra.gmra.mxu1 %v4908_v2  ;;  %v1570_v46 = vpop.f32.mrf.mxu0  ;;  %v2333_v5 = vpop.f32.mrf.mxu1 }
 0x248   : > { %2694 = vmatprep.mubr.bf16.mxu1 %v3661_v28  ;;  %v1614_v47 = vadd.f32 %v1613_v3, %v1570_v46 }
 0x249   : > { %v2290_v2 = vpop.f32.mrf.mxu0  ;;  %v2335_v8 = vpop.f32.mrf.mxu1 }
 0x24a   : > { %v2291_v49 = vadd.f32 %v2290_v2, %v1522_v29 }
 0x24b   : > { %v2292_v4 = vpop.f32.mrf.mxu0  ;;  %v2337_v10 = vpop.f32.mrf.mxu1 }
 0x24c   : > { %v2293_v43 = vadd.f32 %v2292_v4, %v1524_v38  ;;  %v2334_v1 = vadd.f32 %v2333_v5, %v2291_v49  ;;  %v3659_v38 = vld [vmem:[#allocation11 + $0x10] ss:$8 sps:$4 sm:$0xff]  }
 0x24d   : > { %v2294_v6 = vpop.f32.mrf.mxu0  ;;  %v2339_v12 = vpop.f32.mrf.mxu1 }
 0x24e   : > { %v2295_v51 = vadd.f32 %v2294_v6, %v1526_v37  ;;  %v2336_v53 = vadd.f32 %v2335_v8, %v2293_v43 }
 0x24f   : > { %v2296_v9 = vpop.f32.mrf.mxu0 }
 0x250   : > { %v2297_v52 = vadd.f32 %v2296_v9, %v1528_v40  ;;  %v2338_v34 = vadd.f32 %v2337_v10, %v2295_v51 }
 0x252   : > { %v2340_v63 = vadd.f32 %v2339_v12, %v2297_v52 }
 0x27d   : > { %v2376_v11 = vpop.f32.mrf.mxu0 }
 0x27e   : > { %v2377_v55 = vadd.f32 %v2376_v11, %v1608_v44 }
 0x27f   : > { %v2378_v14 = vpop.f32.mrf.mxu0 }
 0x280   : > { %v2379_v54 = vadd.f32 %v2378_v14, %v1610_v41 }
 0x281   : > { %v2380_v16 = vpop.f32.mrf.mxu0 }
 0x282   : > { %v2381_v56 = vadd.f32 %v2380_v16, %v1612_v45 }
 0x283   : > { %v2382_v18 = vpop.f32.mrf.mxu0 }
 0x284   : > { %v2383_v61 = vadd.f32 %v2382_v18, %v1614_v47 }
 0x287   : > { %v2419_v48 = vpop.f32.mrf.mxu1 }
 0x288   : > { %v2420_v30 = vadd.f32 %v2419_v48, %v2377_v55 }
 0x289   : > { %v2421_v17 = vpop.f32.mrf.mxu1 }
 0x28a   : > { %v2422_v28 = vadd.f32 %v2421_v17, %v2379_v54 }
 0x28b   : > { %v2423_v7 = vpop.f32.mrf.mxu1 }
 0x28c   : > { %v2424_v31 = vadd.f32 %v2423_v7, %v2381_v56 }
 0x28d   : > { %v2425_v20 = vpop.f32.mrf.mxu1 }
 0x28e   : > { %v2426_v46 = vadd.f32 %v2425_v20, %v2383_v61 }
 0x2bd   : > { %v2462_v19 = vpop.f32.mrf.mxu0 }
 0x2bf   : > { %v2464_v21 = vpop.f32.mrf.mxu0 }
 0x2c1   : > { %v2466_v24 = vpop.f32.mrf.mxu0 }
 0x2c3   : > { %v2468_v26 = vpop.f32.mrf.mxu0 }
 0x2c7   : > { %v2505_v22 = vpop.f32.mrf.mxu1 }
 0x2c8   : > { %v2506_v62 = vadd.f32 %v2505_v22, %v2462_v19 }
 0x2c9   : > { %v2507_v25 = vpop.f32.mrf.mxu1 }
 0x2ca   : > { %v2508_v32 = vadd.f32 %v2507_v25, %v2464_v21  ;;  %v2600_v14 = vadd.f32 %v2506_v62, %v2334_v1 }
 0x2cb   : > { %v2509_v27 = vpop.f32.mrf.mxu1 }
 0x2cc   : > { %v2510_v57 = vadd.f32 %v2509_v27, %v2466_v24  ;;  %v2601_v6 = vadd.f32 %v2508_v32, %v2336_v53  ;;  %v2608_v21 = vmul.f32 %v2600_v14, %v2600_v14  ;;  %v2624_v27 = vld [vmem:[#allocation11 + $0x20] sm:$0xff] }
 0x2cd   : > { %v2511_v33 = vpop.f32.mrf.mxu1  ;;  %v3167_v29 = vcombine.high %v2624_v27, %v2624_v27 }
 0x2ce   : > { %v2512_v15 = vadd.f32 %v2511_v33, %v2468_v26  ;;  %v2604_v23 = vadd.f32 %v2510_v57, %v2338_v34  ;;  %v2609_v12 = vmul.f32 %v2601_v6, %v2601_v6  ;;  %v3166_v33 = vcombine.low %v2624_v27, %v2624_v27 }
 0x2d0   : > { %v2605_v8 = vadd.f32 %v2512_v15, %v2340_v63  ;;  %v2610_v17 = vmul.f32 %v2604_v23, %v2604_v23 }
 0x2d2   : > { %v2611_v7 = vmul.f32 %v2605_v8, %v2605_v8 }
 0x2fd   : > { %v2548_v35 = vpop.f32.mrf.mxu0 }
 0x2ff   : > { %v2550_v36 = vpop.f32.mrf.mxu0 }
 0x301   : > { %v2552_v58 = vpop.f32.mrf.mxu0 }
 0x303   : > { %v2554_v2 = vpop.f32.mrf.mxu0 }
 0x307   : > { %v2591_v50 = vpop.f32.mrf.mxu1 }
 0x308   : > { %v2592_v59 = vadd.f32 %v2591_v50, %v2548_v35  ;;  %v3656_v35 = vld [vmem:[#allocation11] ss:$8 sps:$4 sm:$0xff]  }
 0x309   : > { %v2593_v39 = vpop.f32.mrf.mxu1 }
 0x30a   : > { %v2594_v60 = vadd.f32 %v2593_v39, %v2550_v36  ;;  %v2602_v3 = vadd.f32 %v2592_v59, %v2420_v30 }
 0x30b   : > { %v2595_v13 = vpop.f32.mrf.mxu1 }
 0x30c   : > { %v2603_v0 = vadd.f32 %v2594_v60, %v2422_v28  ;;  %v2596_v42 = vadd.f32 %v2595_v13, %v2552_v58  ;;  %v2612_v18 = vmul.f32 %v2602_v3, %v2602_v3 }
 0x30d   : > { %v2597_v4 = vpop.f32.mrf.mxu1 }
 0x30e   : > { %v2606_v9 = vadd.f32 %v2596_v42, %v2424_v31  ;;  %v2598_v11 = vadd.f32 %v2597_v4, %v2554_v2  ;;  %v2613_v10 = vmul.f32 %v2603_v0, %v2603_v0  ;;  %v2616_v24 = vadd.f32 %v2612_v18, %v2608_v21 }
 0x310   : > { %v2614_v16 = vmul.f32 %v2606_v9, %v2606_v9  ;;  %v2607_v48 = vadd.f32 %v2598_v11, %v2426_v46  ;;  %v2617_v20 = vadd.f32 %v2613_v10, %v2609_v12 }
 0x312   : > { %v2615_v19 = vmul.f32 %v2607_v48, %v2607_v48  ;;  %v2618_v5 = vadd.f32 %v2614_v16, %v2610_v17 }
 0x314   : > { %v2619_v22 = vadd.f32 %v2615_v19, %v2611_v7  ;;  %v2625_v26 = vpack.c.bf16 %v2618_v5, %v2616_v24 }
 0x316   : > { %v2626_v25 = vpack.c.bf16 %v2619_v22, %v2617_v20 }
 0x318   : > { %2668 = vmatprep.subr.bf16.mxu0 %v2626_v25  ;;  %3170 = vmatprep.subr.bf16.mxu1 %v2626_v25 }
 0x319   : > { %2669 = vmatpush1.bf16.xpose.msra.mxu0 %v2625_v26  ;;  %3171 = vmatpush1.bf16.xpose.msra.mxu1 %v2625_v26 }
 0x320   : > { %2687 = vmatmul.mubr.bf16.vlgmr.msra.gmra.mxu0 %v3656_v35  ;;  %2695 = vmatmul.mubr.bf16.vlgmr.msra.gmra.mxu1 %v3659_v38 }
 0x321   : > { %2702 = vmatprep.mubr.bf16.mxu1 %v3167_v29 }
 0x328   : > { %2703 = vmatmul.mubr.bf16.gmra.mxu1 %v3166_v33 }
 0x3e0   : > { %v2688_v36 = vpop.f32.mrf.mxu0  ;;  %v2696_v37 = vpop.f32.mrf.mxu1 }
 0x3e1   : > { %v2689_v40 = vadd.f32 1.1920929e-07, %v2688_v36  ;;  %v2697_v41 = vadd.f32 1.1920929e-07, %v2696_v37 }
 0x3e2   : > { %v2690_v43 = vpop.f32.mrf.mxu0  ;;  %v2698_v44 = vpop.f32.mrf.mxu1 }
 0x3e3   : > { %3664 = vlog2.f32 %v2689_v40 }
 0x3e4   : > { %3666 = vlog2.f32 %v2697_v41  ;;  %v2691_v45 = vpop.f32.mrf.mxu0  ;;  %v2699_v47 = vpop.f32.mrf.mxu1 }
 0x3e5   : > { %v2692_v49 = vadd.f32 1.1920929e-07, %v2691_v45  ;;  %v2700_v50 = vadd.f32 1.1920929e-07, %v2699_v47 }
 0x3e6   : > { %v2693_v51 = vpop.f32.mrf.mxu0  ;;  %v2701_v52 = vpop.f32.mrf.mxu1 }
 0x3e7   : > { %3668 = vlog2.f32 %v2692_v49 }
 0x3e8   : > { %3670 = vlog2.f32 %v2700_v50  ;;  %v2704_v53 = vpop.f32.mrf.mxu1 }
 0x3e9   : > { %v2705_v54 = vadd.f32 1.1920929e-07, %v2704_v53 }
 0x3ea   : > { %v2706_v55 = vpop.f32.mrf.mxu1 }
 0x3eb   : > { %3672 = vlog2.f32 %v2705_v54 }
 0x3ec   : > { %v2707_v56 = vpop.f32.mrf.mxu1 }
 0x3ee   : > { %v2708_v57 = vpop.f32.mrf.mxu1 }
 0x3f0   : > { %v3665_v58 = vpop.eup %3664 }
 0x3f1   : > { %v3667_v59 = vpop.eup %3666  ;;  %v2711_v39 = vmul.f32 0.6931472, %v3665_v58 }
 0x3f2   : > { %v2715_v28 = vmul.f32 0.6931472, %v3667_v59 }
 0x3f3   : > { %v2720_v32 = vmul.f32 0.4342945, %v2711_v39 }
 0x3f4   : > { %v3669_v15 = vpop.eup %3668  ;;  %v2722_v60 = vmul.f32 0.4342945, %v2715_v28 }
 0x3f5   : > { %v3671_v34 = vpop.eup %3670  ;;  %v2725_v61 = vmul.f32 20.0, %v2720_v32  ;;  %v2713_v30 = vmul.f32 0.6931472, %v3669_v15 }
 0x3f6   : > { %v2727_v62 = vmul.f32 20.0, %v2722_v60  ;;  %v2717_v13 = vmul.f32 0.6931472, %v3671_v34 }
 0x3f7   : > { %v2730_v63 = vmul.f32 0.9999999, %v2725_v61  ;;  %v2721_v31 = vmul.f32 0.4342945, %v2713_v30 }
 0x3f8   : > { %v3673_v0 = vpop.eup %3672  ;;  %v2732_v42 = vmul.f32 0.9999999, %v2727_v62  ;;  %v2723_v1 = vmul.f32 0.4342945, %v2717_v13 }
 0x3f9   : > { %2736 = vst.msk [vmem:[%s375_s13] sm:$0xff] %vm2735_vm9, %v2730_v63  ;;  %v2726_v46 = vmul.f32 20.0, %v2721_v31  ;;  %v2719_v23 = vmul.f32 0.6931472, %v3673_v0 }
 0x3fa   : > { %2738 = vst.msk [vmem:[%s375_s13 + $0x10] sm:$0xff] %vm2735_vm9, %v2732_v42  ;;  %v2728_v2 = vmul.f32 20.0, %v2723_v1 }
 0x3fb   : > { %v2731_v3 = vmul.f32 0.9999999, %v2726_v46  ;;  %v2724_v4 = vmul.f32 0.4342945, %v2719_v23 }
 0x3fc   : > { %v2733_v6 = vmul.f32 0.9999999, %v2728_v2 }
 0x3fd   : > { %2737 = vst.msk [vmem:[%s375_s13 + $0x8] sm:$0xff] %vm2735_vm9, %v2731_v3  ;;  %v2729_v8 = vmul.f32 20.0, %v2724_v4 }
 0x3fe   : > { %2739 = vst.msk [vmem:[%s375_s13 + $0x18] sm:$0xff] %vm2735_vm9, %v2733_v6 }
 0x3ff   : > { %v2734_v9 = vmul.f32 0.9999999, %v2729_v8 }
 0x401   : > { %2740 = vst.msk [vmem:[%s375_s13 + $0x20] sm:$0xff] %vm2735_vm9, %v2734_v9 }
 0x402 PF: > { %s22_s23 = sadd.s32 1, %s3873_s23   ;;  %s4956_s18 = smov %s3857_s19 }
 0x403   : > { %p19_p4 = scmp.ge.s32.totalorder %s22_s23, 4   ;;  %s4957_s19 = smov %s3861_s20 }
 0x404   : > { %s4958_s20 = smov %s4021_s17  ;;  %s4959_s21 = smov %s3869_s22 }
 0x405   : > { %s4960_s22 = smov %s4962_s10  ;;  %21 = sbr.rel (!%p19_p4) target bundleno = 12 (0xc), region = 105 }
 0x40a   :  { %2768 = vsyncpa [#allocation5], 1 }
 0x40b   :  { %2770 = vsyncpa [#allocation5 + $0x1], 1 }
 0x40c   :  { %2771 = vsyncpa [#allocation7], 1 }
 0x40d   :  { %2773 = vsyncpa [#allocation7 + $0x1], 1 }
 0x40e   :  { %2774 = vsyncpa [#allocation10], 1 }

</bundles_post_ra>
